<compile_context>
chip_gen: v5e
topology: v5e:2x2
jax: 0.10.0
libtpu: 0.0.40
codegen_flags: <defaults>
</compile_context>

<pallas_src>
import functools

import jax
import jax.numpy as jnp
from jax import lax
from jax.experimental import pallas as pl
from jax.experimental.pallas import tpu as pltpu

EMBED = 64
HIDDEN = 128
LAT_CLASSES = 3
LON_CLASSES = 2
HEAD_OUT = LAT_CLASSES + LON_CLASSES


def _use_bf16_gates():
    """bf16 VPU/EUP exists on v6e/v7x; fall back to f32 elsewhere (v5e etc.)."""
    try:
        kind = jax.devices()[0].device_kind.lower()
    except Exception:
        return False
    return ("v6" in kind) or ("v7" in kind)


def _maneuver_kernel(
    x_ref,        # (T*Bp, I)   f32   all timesteps, batch-padded, flattened
    we_ref,       # (I, 64)     bf16  embedding weight
    be_ref,       # (1, 64)     f32   embedding bias
    wih_ref,      # (64, 512)   bf16  LSTM input->gates weight  (gate order i,f,o,g)
    whh_ref,      # (128, 512)  bf16  LSTM hidden->gates weight (gate order i,f,o,g)
    b_ref,        # (1, 512)    f32   LSTM combined bias b_ih+b_hh (i,f,o,g)
    whead_ref,    # (128, 5)    bf16  fused [lat | lon] head weight
    bhead_ref,    # (1, 5)      f32   fused head bias
    out_ref,      # (Bp, 5)     f32   fused [lat | lon] softmax probabilities
    gx_ref,       # (T*Bp, 512) f32   scratch: precomputed input->gates
    *, seq_len, batch, bf16_gates,
):
    H = HIDDEN
    gate_dt = jnp.bfloat16 if bf16_gates else jnp.float32

    # ---- embedding + LeakyReLU(0.1) for ALL timesteps (one batched matmul) ----
    emb = jnp.dot(x_ref[...].astype(jnp.bfloat16), we_ref[...],
                  preferred_element_type=jnp.float32) + be_ref[...]   # (T*Bp, 64)
    emb = jnp.where(emb > 0, emb, 0.1 * emb)

    # ---- hoisted input->gates projection + bias (off the serial path) --------
    gx_ref[...] = jnp.dot(emb.astype(jnp.bfloat16), wih_ref[...],
                          preferred_element_type=jnp.float32) + b_ref[...]

    def nonlin(gates):
        # gate order [i, f, o, g]: one sigmoid over (B, 3H), one tanh over (B, H)
        g = gates.astype(gate_dt)
        sig = jax.nn.sigmoid(g[:, :3 * H]).astype(jnp.float32)
        g_g = jnp.tanh(g[:, 3 * H:]).astype(jnp.float32)
        return (sig[:, 0 * H:1 * H], sig[:, 1 * H:2 * H],
                sig[:, 2 * H:3 * H], g_g)

    # ---- peeled step t = 0: h0 = c0 = 0 => gates_0 = gx[0:B], c1 = i*g --------
    i0, _f0, o0, g0 = nonlin(gx_ref[pl.ds(0, batch), :])
    c1 = i0 * g0
    h1 = o0 * jnp.tanh(c1.astype(gate_dt)).astype(jnp.float32)

    def step(t, carry):
        h, c = carry
        row = pl.multiple_of(t * batch, batch)
        # Whh re-read from VMEM each step (not kept live across the unrolled
        # loop); the vld is hidden under the MXU latency, vregs stay free.
        gates = gx_ref[pl.ds(row, batch), :] + jnp.dot(
            h.astype(jnp.bfloat16), whh_ref[...],
            preferred_element_type=jnp.float32)
        i_g, f_g, o_g, g_g = nonlin(gates)
        c_new = f_g * c + i_g * g_g
        h_new = o_g * jnp.tanh(c_new.astype(gate_dt)).astype(jnp.float32)
        return h_new, c_new

    h_last, _ = lax.fori_loop(1, seq_len, step, (h1, c1), unroll=True)

    # ---- fused heads on lstm_out[-1] + per-segment softmax -------------------
    head = jnp.dot(h_last.astype(jnp.bfloat16), whead_ref[...],
                   preferred_element_type=jnp.float32) + bhead_ref[...]  # (Bp, 5)

    col = lax.broadcasted_iota(jnp.int32, head.shape, 1)
    is_lat = col < LAT_CLASSES
    m_lat = jnp.max(jnp.where(is_lat, head, -jnp.inf), axis=1, keepdims=True)
    m_lon = jnp.max(jnp.where(is_lat, -jnp.inf, head), axis=1, keepdims=True)
    e = jnp.exp(head - jnp.where(is_lat, m_lat, m_lon))
    s_lat = jnp.sum(jnp.where(is_lat, e, 0.0), axis=1, keepdims=True)
    s_lon = jnp.sum(jnp.where(is_lat, 0.0, e), axis=1, keepdims=True)
    denom = jnp.where(is_lat, s_lat, s_lon)
    out_ref[...] = e * pl.reciprocal(denom, approx=True)


@jax.jit
def maneuver_forward(x, kparams):
    """x: (T, B, input_size) float32.  kparams: prepared kernel params.
    Returns (lat_pred (B, 3), lon_pred (B, 2))."""
    T, B, I = x.shape
    we, be, wih, whh, b, whead, bhead = kparams

    # Pad batch to a multiple of 8 (f32 sublane); extra rows are discarded.
    Bp = max(8, ((B + 7) // 8) * 8)
    if Bp != B:
        x = jnp.pad(x, ((0, 0), (0, Bp - B), (0, 0)))
    x_flat = x.reshape(T * Bp, I)   # layout plumbing in the wrapper

    kernel = functools.partial(_maneuver_kernel, seq_len=T, batch=Bp,
                               bf16_gates=_use_bf16_gates())
    vmem = pl.BlockSpec(memory_space=pltpu.MemorySpace.VMEM)

    flops = (2 * T * Bp * I * EMBED            # embedding
             + 2 * T * Bp * EMBED * 4 * HIDDEN   # input->gates
             + 2 * T * Bp * HIDDEN * 4 * HIDDEN  # hidden->gates (recurrence)
             + 2 * Bp * HIDDEN * HEAD_OUT)       # heads
    transcendentals = T * Bp * 5 * HIDDEN + 2 * Bp * HEAD_OUT
    bytes_accessed = (x_flat.size * 4 + we.size * 2 + be.size * 4
                      + wih.size * 2 + whh.size * 2 + b.size * 4
                      + whead.size * 2 + bhead.size * 4 + Bp * HEAD_OUT * 4)

    out = pl.pallas_call(
        kernel,
        out_shape=jax.ShapeDtypeStruct((Bp, HEAD_OUT), jnp.float32),
        in_specs=[vmem] * 8,
        out_specs=vmem,
        scratch_shapes=[pltpu.VMEM((T * Bp, 4 * HIDDEN), jnp.float32)],
        cost_estimate=pl.CostEstimate(flops=flops,
                                      transcendentals=transcendentals,
                                      bytes_accessed=bytes_accessed),
    )(x_flat, we, be, wih, whh, b, whead, bhead)

    return out[:B, :LAT_CLASSES], out[:B, LAT_CLASSES:LAT_CLASSES + LON_CLASSES]


def init_params(key, input_size):
    """Deterministic synthetic parameters matching Maneuver_class shapes.
    Stored (in, out); LSTM gate order is PyTorch's [i, f, g, o]."""
    ks = jax.random.split(key, 9)
    scale = 0.1
    we = scale * jax.random.normal(ks[0], (input_size, EMBED), jnp.float32)
    be = scale * jax.random.normal(ks[1], (1, EMBED), jnp.float32)
    wih = scale * jax.random.normal(ks[2], (EMBED, 4 * HIDDEN), jnp.float32)
    whh = scale * jax.random.normal(ks[3], (HIDDEN, 4 * HIDDEN), jnp.float32)
    b = scale * jax.random.normal(ks[4], (1, 4 * HIDDEN), jnp.float32)  # b_ih + b_hh
    wlat = scale * jax.random.normal(ks[5], (HIDDEN, LAT_CLASSES), jnp.float32)
    blat = scale * jax.random.normal(ks[6], (1, LAT_CLASSES), jnp.float32)
    wlon = scale * jax.random.normal(ks[7], (HIDDEN, LON_CLASSES), jnp.float32)
    blon = scale * jax.random.normal(ks[8], (1, LON_CLASSES), jnp.float32)
    return (we, be, wih, whh, b, wlat, blat, wlon, blon)


def prepare_params(params):
    """One-time weight preparation for the kernel:
    - permute LSTM gate columns [i,f,g,o] -> [i,f,o,g]
    - fuse lat/lon head weights into a single (128, 5) matmul
    - cast matmul weights to bf16 (biases stay f32)."""
    we, be, wih, whh, b, wlat, blat, wlon, blon = params
    H = HIDDEN

    def reorder(w):
        return jnp.concatenate(
            [w[..., 0:H], w[..., H:2 * H], w[..., 3 * H:4 * H], w[..., 2 * H:3 * H]],
            axis=-1)

    wih_r = reorder(wih).astype(jnp.bfloat16)
    whh_r = reorder(whh).astype(jnp.bfloat16)
    b_r = reorder(b)                                                    # f32
    whead = jnp.concatenate([wlat, wlon], axis=1).astype(jnp.bfloat16)  # (128, 5)
    bhead = jnp.concatenate([blat, blon], axis=1)                       # (1, 5)
    return (we.astype(jnp.bfloat16), be, wih_r, whh_r, b_r, whead, bhead)


def reference_forward(x, params):
    """Pure-JAX f32 reference with the original module semantics."""
    (we, be, wih, whh, b, wlat, blat, wlon, blon) = params
    emb = x @ we + be
    emb = jnp.where(emb > 0, emb, 0.1 * emb)

    T, B, _ = x.shape
    h = jnp.zeros((B, HIDDEN), jnp.float32)
    c = jnp.zeros((B, HIDDEN), jnp.float32)

    def step(carry, e_t):
        h, c = carry
        gates = e_t @ wih + h @ whh + b
        i = jax.nn.sigmoid(gates[:, 0 * HIDDEN:1 * HIDDEN])
        f = jax.nn.sigmoid(gates[:, 1 * HIDDEN:2 * HIDDEN])
        g = jnp.tanh(gates[:, 2 * HIDDEN:3 * HIDDEN])
        o = jax.nn.sigmoid(gates[:, 3 * HIDDEN:4 * HIDDEN])
        c = f * c + i * g
        h = o * jnp.tanh(c)
        return (h, c), None

    (h, c), _ = jax.lax.scan(step, (h, c), emb)
    lat = jax.nn.softmax(h @ wlat + blat, axis=1)
    lon = jax.nn.softmax(h @ wlon + blon, axis=1)
    return lat, lon


if __name__ == "__main__":
    key = jax.random.PRNGKey(0)
    k_x, k_p = jax.random.split(key)

    T, B, INPUT_SIZE = 8, 4, 16            # seq=8, batch=4, input_size=16
    x = jax.random.normal(k_x, (T, B, INPUT_SIZE), jnp.float32)
    params = init_params(k_p, INPUT_SIZE)
    kparams = prepare_params(params)

    lat, lon = maneuver_forward(x, kparams)
    jax.block_until_ready((lat, lon))

    lat_ref, lon_ref = reference_forward(x, params)

    assert lat.shape == (B, LAT_CLASSES) and lon.shape == (B, LON_CLASSES)
    assert bool(jnp.all(jnp.isfinite(lat))) and bool(jnp.all(jnp.isfinite(lon)))
    # Kernel uses bf16 matmul operands (and bf16 gate nonlinearities on v6e/v7x)
    # with f32 accumulation; softmax probabilities differ from the pure-f32
    # reference by ~1e-3, so use a conservative tolerance.
    assert jnp.allclose(lat, lat_ref, atol=3e-2, rtol=3e-2)
    assert jnp.allclose(lon, lon_ref, atol=3e-2, rtol=3e-2)
    # softmax rows must sum to ~1 (approx reciprocal in the denominator).
    assert jnp.allclose(jnp.sum(lat, axis=1), 1.0, atol=5e-3)
    assert jnp.allclose(jnp.sum(lon, axis=1), 1.0, atol=5e-3)

    print("KERNEL_OK")
</pallas_src>

<mosaic_0001>
module attributes {stable_mosaic.version = 11 : i64} {
  func.func @_maneuver_kernel(%arg0: memref<64x16xf32, #tpu.memory_space<vmem>>, %arg1: memref<16x64xbf16, #tpu.memory_space<vmem>>, %arg2: memref<1x64xf32, #tpu.memory_space<vmem>>, %arg3: memref<64x512xbf16, #tpu.memory_space<vmem>>, %arg4: memref<128x512xbf16, #tpu.memory_space<vmem>>, %arg5: memref<1x512xf32, #tpu.memory_space<vmem>>, %arg6: memref<128x5xbf16, #tpu.memory_space<vmem>>, %arg7: memref<1x5xf32, #tpu.memory_space<vmem>>, %arg8: memref<8x5xf32, #tpu.memory_space<vmem>>, %arg9: memref<64x512xf32, #tpu.memory_space<vmem>>) attributes {dimension_semantics = [], scalar_prefetch = 0 : i64, scratch_operands = 1 : i64, tpu.core_type = #tpu.core_type<tc>} {
    %c0 = arith.constant 0 : index
    %c0_0 = arith.constant 0 : index
    %0 = vector.load %arg0[%c0, %c0_0] : memref<64x16xf32, #tpu.memory_space<vmem>>, vector<64x16xf32>
    %1 = arith.truncf %0 : vector<64x16xf32> to vector<64x16xbf16>
    %c0_1 = arith.constant 0 : index
    %c0_2 = arith.constant 0 : index
    %2 = vector.load %arg1[%c0_1, %c0_2] : memref<16x64xbf16, #tpu.memory_space<vmem>>, vector<16x64xbf16>
    %cst = arith.constant dense<0.000000e+00> : vector<64x64xf32>
    %3 = tpu.matmul %1, %2, %cst {dimension_numbers = #tpu.dot_dimension_numbers<[1], [0], [0], [1], [0, 0, 1, 1], [], []>} : vector<64x16xbf16>, vector<16x64xbf16>, vector<64x64xf32> -> vector<64x64xf32>
    %c0_3 = arith.constant 0 : index
    %c0_4 = arith.constant 0 : index
    %4 = vector.load %arg2[%c0_3, %c0_4] : memref<1x64xf32, #tpu.memory_space<vmem>>, vector<1x64xf32>
    %5 = vector.broadcast %4 : vector<1x64xf32> to vector<64x64xf32>
    %6 = arith.addf %3, %5 : vector<64x64xf32>
    %cst_5 = arith.constant 0.000000e+00 : f32
    %7 = vector.broadcast %cst_5 : f32 to vector<64x64xf32>
    %8 = arith.cmpf ogt, %6, %7 : vector<64x64xf32>
    %cst_6 = arith.constant 1.000000e-01 : f32
    %9 = vector.broadcast %cst_6 : f32 to vector<64x64xf32>
    %10 = arith.mulf %9, %6 : vector<64x64xf32>
    %11 = arith.select %8, %6, %10 : vector<64x64xi1>, vector<64x64xf32>
    %12 = arith.truncf %11 : vector<64x64xf32> to vector<64x64xbf16>
    %c0_7 = arith.constant 0 : index
    %c0_8 = arith.constant 0 : index
    %13 = vector.load %arg3[%c0_7, %c0_8] : memref<64x512xbf16, #tpu.memory_space<vmem>>, vector<64x512xbf16>
    %cst_9 = arith.constant dense<0.000000e+00> : vector<64x512xf32>
    %14 = tpu.matmul %12, %13, %cst_9 {dimension_numbers = #tpu.dot_dimension_numbers<[1], [0], [0], [1], [0, 0, 1, 1], [], []>} : vector<64x64xbf16>, vector<64x512xbf16>, vector<64x512xf32> -> vector<64x512xf32>
    %c0_10 = arith.constant 0 : index
    %c0_11 = arith.constant 0 : index
    %15 = vector.load %arg5[%c0_10, %c0_11] : memref<1x512xf32, #tpu.memory_space<vmem>>, vector<1x512xf32>
    %16 = vector.broadcast %15 : vector<1x512xf32> to vector<64x512xf32>
    %17 = arith.addf %14, %16 : vector<64x512xf32>
    %c0_12 = arith.constant 0 : index
    %c0_13 = arith.constant 0 : index
    %18 = vector.load %arg9[%c0_12, %c0_13] : memref<64x512xf32, #tpu.memory_space<vmem>>, vector<64x512xf32>
    tpu.vector_store %arg9[%c0_12, %c0_13], %17 {strides = array<i32>} : memref<64x512xf32, #tpu.memory_space<vmem>>, vector<64x512xf32>,
    %c0_14 = arith.constant 0 : index
    %c0_15 = arith.constant 0 : index
    %19 = vector.load %arg9[%c0_14, %c0_15] : memref<64x512xf32, #tpu.memory_space<vmem>>, vector<8x512xf32>
    %20 = vector.extract_strided_slice %19 {offsets = [0, 0], sizes = [8, 384], strides = [1, 1]} : vector<8x512xf32> to vector<8x384xf32>
    %21 = arith.negf %20 : vector<8x384xf32>
    %22 = math.exp %21 : vector<8x384xf32>
    %cst_16 = arith.constant 1.000000e+00 : f32
    %23 = vector.broadcast %cst_16 : f32 to vector<8x384xf32>
    %24 = arith.addf %23, %22 : vector<8x384xf32>
    %25 = arith.divf %23, %24 : vector<8x384xf32>
    %26 = vector.extract_strided_slice %19 {offsets = [0, 384], sizes = [8, 128], strides = [1, 1]} : vector<8x512xf32> to vector<8x128xf32>
    %27 = math.tanh %26 : vector<8x128xf32>
    %28 = vector.extract_strided_slice %25 {offsets = [0, 0], sizes = [8, 128], strides = [1, 1]} : vector<8x384xf32> to vector<8x128xf32>
    %29 = vector.extract_strided_slice %25 {offsets = [0, 256], sizes = [8, 128], strides = [1, 1]} : vector<8x384xf32> to vector<8x128xf32>
    %30 = arith.mulf %28, %27 : vector<8x128xf32>
    %31 = math.tanh %30 : vector<8x128xf32>
    %32 = arith.mulf %29, %31 : vector<8x128xf32>
    %c1_i32 = arith.constant 1 : i32
    %c8_i32 = arith.constant 8 : i32
    %33 = arith.muli %c1_i32, %c8_i32 : i32
    %34 = tpu.assume_multiple %33, 8 : i32
    %35 = arith.index_cast %34 : i32 to index
    %c0_17 = arith.constant 0 : index
    %36 = vector.load %arg9[%35, %c0_17] : memref<64x512xf32, #tpu.memory_space<vmem>>, vector<8x512xf32>
    %37 = arith.truncf %32 : vector<8x128xf32> to vector<8x128xbf16>
    %c0_18 = arith.constant 0 : index
    %c0_19 = arith.constant 0 : index
    %38 = vector.load %arg4[%c0_18, %c0_19] : memref<128x512xbf16, #tpu.memory_space<vmem>>, vector<128x512xbf16>
    %cst_20 = arith.constant dense<0.000000e+00> : vector<8x512xf32>
    %39 = tpu.matmul %37, %38, %cst_20 {dimension_numbers = #tpu.dot_dimension_numbers<[1], [0], [0], [1], [0, 0, 1, 1], [], []>} : vector<8x128xbf16>, vector<128x512xbf16>, vector<8x512xf32> -> vector<8x512xf32>
    %40 = arith.addf %36, %39 : vector<8x512xf32>
    %41 = vector.extract_strided_slice %40 {offsets = [0, 0], sizes = [8, 384], strides = [1, 1]} : vector<8x512xf32> to vector<8x384xf32>
    %42 = arith.negf %41 : vector<8x384xf32>
    %43 = math.exp %42 : vector<8x384xf32>
    %cst_21 = arith.constant 1.000000e+00 : f32
    %44 = vector.broadcast %cst_21 : f32 to vector<8x384xf32>
    %45 = arith.addf %44, %43 : vector<8x384xf32>
    %46 = arith.divf %44, %45 : vector<8x384xf32>
    %47 = vector.extract_strided_slice %40 {offsets = [0, 384], sizes = [8, 128], strides = [1, 1]} : vector<8x512xf32> to vector<8x128xf32>
    %48 = math.tanh %47 : vector<8x128xf32>
    %49 = vector.extract_strided_slice %46 {offsets = [0, 0], sizes = [8, 128], strides = [1, 1]} : vector<8x384xf32> to vector<8x128xf32>
    %50 = vector.extract_strided_slice %46 {offsets = [0, 128], sizes = [8, 128], strides = [1, 1]} : vector<8x384xf32> to vector<8x128xf32>
    %51 = vector.extract_strided_slice %46 {offsets = [0, 256], sizes = [8, 128], strides = [1, 1]} : vector<8x384xf32> to vector<8x128xf32>
    %52 = arith.mulf %50, %30 : vector<8x128xf32>
    %53 = arith.mulf %49, %48 : vector<8x128xf32>
    %54 = arith.addf %52, %53 : vector<8x128xf32>
    %55 = math.tanh %54 : vector<8x128xf32>
    %56 = arith.mulf %51, %55 : vector<8x128xf32>
    %c2_i32 = arith.constant 2 : i32
    %c8_i32_22 = arith.constant 8 : i32
    %57 = arith.muli %c2_i32, %c8_i32_22 : i32
    %58 = tpu.assume_multiple %57, 8 : i32
    %59 = arith.index_cast %58 : i32 to index
    %c0_23 = arith.constant 0 : index
    %60 = vector.load %arg9[%59, %c0_23] : memref<64x512xf32, #tpu.memory_space<vmem>>, vector<8x512xf32>
    %61 = arith.truncf %56 : vector<8x128xf32> to vector<8x128xbf16>
    %c0_24 = arith.constant 0 : index
    %c0_25 = arith.constant 0 : index
    %62 = vector.load %arg4[%c0_24, %c0_25] : memref<128x512xbf16, #tpu.memory_space<vmem>>, vector<128x512xbf16>
    %cst_26 = arith.constant dense<0.000000e+00> : vector<8x512xf32>
    %63 = tpu.matmul %61, %62, %cst_26 {dimension_numbers = #tpu.dot_dimension_numbers<[1], [0], [0], [1], [0, 0, 1, 1], [], []>} : vector<8x128xbf16>, vector<128x512xbf16>, vector<8x512xf32> -> vector<8x512xf32>
    %64 = arith.addf %60, %63 : vector<8x512xf32>
    %65 = vector.extract_strided_slice %64 {offsets = [0, 0], sizes = [8, 384], strides = [1, 1]} : vector<8x512xf32> to vector<8x384xf32>
    %66 = arith.negf %65 : vector<8x384xf32>
    %67 = math.exp %66 : vector<8x384xf32>
    %cst_27 = arith.constant 1.000000e+00 : f32
    %68 = vector.broadcast %cst_27 : f32 to vector<8x384xf32>
    %69 = arith.addf %68, %67 : vector<8x384xf32>
    %70 = arith.divf %68, %69 : vector<8x384xf32>
    %71 = vector.extract_strided_slice %64 {offsets = [0, 384], sizes = [8, 128], strides = [1, 1]} : vector<8x512xf32> to vector<8x128xf32>
    %72 = math.tanh %71 : vector<8x128xf32>
    %73 = vector.extract_strided_slice %70 {offsets = [0, 0], sizes = [8, 128], strides = [1, 1]} : vector<8x384xf32> to vector<8x128xf32>
    %74 = vector.extract_strided_slice %70 {offsets = [0, 128], sizes = [8, 128], strides = [1, 1]} : vector<8x384xf32> to vector<8x128xf32>
    %75 = vector.extract_strided_slice %70 {offsets = [0, 256], sizes = [8, 128], strides = [1, 1]} : vector<8x384xf32> to vector<8x128xf32>
    %76 = arith.mulf %74, %54 : vector<8x128xf32>
    %77 = arith.mulf %73, %72 : vector<8x128xf32>
    %78 = arith.addf %76, %77 : vector<8x128xf32>
    %79 = math.tanh %78 : vector<8x128xf32>
    %80 = arith.mulf %75, %79 : vector<8x128xf32>
    %c3_i32 = arith.constant 3 : i32
    %c8_i32_28 = arith.constant 8 : i32
    %81 = arith.muli %c3_i32, %c8_i32_28 : i32
    %82 = tpu.assume_multiple %81, 8 : i32
    %83 = arith.index_cast %82 : i32 to index
    %c0_29 = arith.constant 0 : index
    %84 = vector.load %arg9[%83, %c0_29] : memref<64x512xf32, #tpu.memory_space<vmem>>, vector<8x512xf32>
    %85 = arith.truncf %80 : vector<8x128xf32> to vector<8x128xbf16>
    %c0_30 = arith.constant 0 : index
    %c0_31 = arith.constant 0 : index
    %86 = vector.load %arg4[%c0_30, %c0_31] : memref<128x512xbf16, #tpu.memory_space<vmem>>, vector<128x512xbf16>
    %cst_32 = arith.constant dense<0.000000e+00> : vector<8x512xf32>
    %87 = tpu.matmul %85, %86, %cst_32 {dimension_numbers = #tpu.dot_dimension_numbers<[1], [0], [0], [1], [0, 0, 1, 1], [], []>} : vector<8x128xbf16>, vector<128x512xbf16>, vector<8x512xf32> -> vector<8x512xf32>
    %88 = arith.addf %84, %87 : vector<8x512xf32>
    %89 = vector.extract_strided_slice %88 {offsets = [0, 0], sizes = [8, 384], strides = [1, 1]} : vector<8x512xf32> to vector<8x384xf32>
    %90 = arith.negf %89 : vector<8x384xf32>
    %91 = math.exp %90 : vector<8x384xf32>
    %cst_33 = arith.constant 1.000000e+00 : f32
    %92 = vector.broadcast %cst_33 : f32 to vector<8x384xf32>
    %93 = arith.addf %92, %91 : vector<8x384xf32>
    %94 = arith.divf %92, %93 : vector<8x384xf32>
    %95 = vector.extract_strided_slice %88 {offsets = [0, 384], sizes = [8, 128], strides = [1, 1]} : vector<8x512xf32> to vector<8x128xf32>
    %96 = math.tanh %95 : vector<8x128xf32>
    %97 = vector.extract_strided_slice %94 {offsets = [0, 0], sizes = [8, 128], strides = [1, 1]} : vector<8x384xf32> to vector<8x128xf32>
    %98 = vector.extract_strided_slice %94 {offsets = [0, 128], sizes = [8, 128], strides = [1, 1]} : vector<8x384xf32> to vector<8x128xf32>
    %99 = vector.extract_strided_slice %94 {offsets = [0, 256], sizes = [8, 128], strides = [1, 1]} : vector<8x384xf32> to vector<8x128xf32>
    %100 = arith.mulf %98, %78 : vector<8x128xf32>
    %101 = arith.mulf %97, %96 : vector<8x128xf32>
    %102 = arith.addf %100, %101 : vector<8x128xf32>
    %103 = math.tanh %102 : vector<8x128xf32>
    %104 = arith.mulf %99, %103 : vector<8x128xf32>
    %c4_i32 = arith.constant 4 : i32
    %c8_i32_34 = arith.constant 8 : i32
    %105 = arith.muli %c4_i32, %c8_i32_34 : i32
    %106 = tpu.assume_multiple %105, 8 : i32
    %107 = arith.index_cast %106 : i32 to index
    %c0_35 = arith.constant 0 : index
    %108 = vector.load %arg9[%107, %c0_35] : memref<64x512xf32, #tpu.memory_space<vmem>>, vector<8x512xf32>
    %109 = arith.truncf %104 : vector<8x128xf32> to vector<8x128xbf16>
    %c0_36 = arith.constant 0 : index
    %c0_37 = arith.constant 0 : index
    %110 = vector.load %arg4[%c0_36, %c0_37] : memref<128x512xbf16, #tpu.memory_space<vmem>>, vector<128x512xbf16>
    %cst_38 = arith.constant dense<0.000000e+00> : vector<8x512xf32>
    %111 = tpu.matmul %109, %110, %cst_38 {dimension_numbers = #tpu.dot_dimension_numbers<[1], [0], [0], [1], [0, 0, 1, 1], [], []>} : vector<8x128xbf16>, vector<128x512xbf16>, vector<8x512xf32> -> vector<8x512xf32>
    %112 = arith.addf %108, %111 : vector<8x512xf32>
    %113 = vector.extract_strided_slice %112 {offsets = [0, 0], sizes = [8, 384], strides = [1, 1]} : vector<8x512xf32> to vector<8x384xf32>
    %114 = arith.negf %113 : vector<8x384xf32>
    %115 = math.exp %114 : vector<8x384xf32>
    %cst_39 = arith.constant 1.000000e+00 : f32
    %116 = vector.broadcast %cst_39 : f32 to vector<8x384xf32>
    %117 = arith.addf %116, %115 : vector<8x384xf32>
    %118 = arith.divf %116, %117 : vector<8x384xf32>
    %119 = vector.extract_strided_slice %112 {offsets = [0, 384], sizes = [8, 128], strides = [1, 1]} : vector<8x512xf32> to vector<8x128xf32>
    %120 = math.tanh %119 : vector<8x128xf32>
    %121 = vector.extract_strided_slice %118 {offsets = [0, 0], sizes = [8, 128], strides = [1, 1]} : vector<8x384xf32> to vector<8x128xf32>
    %122 = vector.extract_strided_slice %118 {offsets = [0, 128], sizes = [8, 128], strides = [1, 1]} : vector<8x384xf32> to vector<8x128xf32>
    %123 = vector.extract_strided_slice %118 {offsets = [0, 256], sizes = [8, 128], strides = [1, 1]} : vector<8x384xf32> to vector<8x128xf32>
    %124 = arith.mulf %122, %102 : vector<8x128xf32>
    %125 = arith.mulf %121, %120 : vector<8x128xf32>
    %126 = arith.addf %124, %125 : vector<8x128xf32>
    %127 = math.tanh %126 : vector<8x128xf32>
    %128 = arith.mulf %123, %127 : vector<8x128xf32>
    %c5_i32 = arith.constant 5 : i32
    %c8_i32_40 = arith.constant 8 : i32
    %129 = arith.muli %c5_i32, %c8_i32_40 : i32
    %130 = tpu.assume_multiple %129, 8 : i32
    %131 = arith.index_cast %130 : i32 to index
    %c0_41 = arith.constant 0 : index
    %132 = vector.load %arg9[%131, %c0_41] : memref<64x512xf32, #tpu.memory_space<vmem>>, vector<8x512xf32>
    %133 = arith.truncf %128 : vector<8x128xf32> to vector<8x128xbf16>
    %c0_42 = arith.constant 0 : index
    %c0_43 = arith.constant 0 : index
    %134 = vector.load %arg4[%c0_42, %c0_43] : memref<128x512xbf16, #tpu.memory_space<vmem>>, vector<128x512xbf16>
    %cst_44 = arith.constant dense<0.000000e+00> : vector<8x512xf32>
    %135 = tpu.matmul %133, %134, %cst_44 {dimension_numbers = #tpu.dot_dimension_numbers<[1], [0], [0], [1], [0, 0, 1, 1], [], []>} : vector<8x128xbf16>, vector<128x512xbf16>, vector<8x512xf32> -> vector<8x512xf32>
    %136 = arith.addf %132, %135 : vector<8x512xf32>
    %137 = vector.extract_strided_slice %136 {offsets = [0, 0], sizes = [8, 384], strides = [1, 1]} : vector<8x512xf32> to vector<8x384xf32>
    %138 = arith.negf %137 : vector<8x384xf32>
    %139 = math.exp %138 : vector<8x384xf32>
    %cst_45 = arith.constant 1.000000e+00 : f32
    %140 = vector.broadcast %cst_45 : f32 to vector<8x384xf32>
    %141 = arith.addf %140, %139 : vector<8x384xf32>
    %142 = arith.divf %140, %141 : vector<8x384xf32>
    %143 = vector.extract_strided_slice %136 {offsets = [0, 384], sizes = [8, 128], strides = [1, 1]} : vector<8x512xf32> to vector<8x128xf32>
    %144 = math.tanh %143 : vector<8x128xf32>
    %145 = vector.extract_strided_slice %142 {offsets = [0, 0], sizes = [8, 128], strides = [1, 1]} : vector<8x384xf32> to vector<8x128xf32>
    %146 = vector.extract_strided_slice %142 {offsets = [0, 128], sizes = [8, 128], strides = [1, 1]} : vector<8x384xf32> to vector<8x128xf32>
    %147 = vector.extract_strided_slice %142 {offsets = [0, 256], sizes = [8, 128], strides = [1, 1]} : vector<8x384xf32> to vector<8x128xf32>
    %148 = arith.mulf %146, %126 : vector<8x128xf32>
    %149 = arith.mulf %145, %144 : vector<8x128xf32>
    %150 = arith.addf %148, %149 : vector<8x128xf32>
    %151 = math.tanh %150 : vector<8x128xf32>
    %152 = arith.mulf %147, %151 : vector<8x128xf32>
    %c6_i32 = arith.constant 6 : i32
    %c8_i32_46 = arith.constant 8 : i32
    %153 = arith.muli %c6_i32, %c8_i32_46 : i32
    %154 = tpu.assume_multiple %153, 8 : i32
    %155 = arith.index_cast %154 : i32 to index
    %c0_47 = arith.constant 0 : index
    %156 = vector.load %arg9[%155, %c0_47] : memref<64x512xf32, #tpu.memory_space<vmem>>, vector<8x512xf32>
    %157 = arith.truncf %152 : vector<8x128xf32> to vector<8x128xbf16>
    %c0_48 = arith.constant 0 : index
    %c0_49 = arith.constant 0 : index
    %158 = vector.load %arg4[%c0_48, %c0_49] : memref<128x512xbf16, #tpu.memory_space<vmem>>, vector<128x512xbf16>
    %cst_50 = arith.constant dense<0.000000e+00> : vector<8x512xf32>
    %159 = tpu.matmul %157, %158, %cst_50 {dimension_numbers = #tpu.dot_dimension_numbers<[1], [0], [0], [1], [0, 0, 1, 1], [], []>} : vector<8x128xbf16>, vector<128x512xbf16>, vector<8x512xf32> -> vector<8x512xf32>
    %160 = arith.addf %156, %159 : vector<8x512xf32>
    %161 = vector.extract_strided_slice %160 {offsets = [0, 0], sizes = [8, 384], strides = [1, 1]} : vector<8x512xf32> to vector<8x384xf32>
    %162 = arith.negf %161 : vector<8x384xf32>
    %163 = math.exp %162 : vector<8x384xf32>
    %cst_51 = arith.constant 1.000000e+00 : f32
    %164 = vector.broadcast %cst_51 : f32 to vector<8x384xf32>
    %165 = arith.addf %164, %163 : vector<8x384xf32>
    %166 = arith.divf %164, %165 : vector<8x384xf32>
    %167 = vector.extract_strided_slice %160 {offsets = [0, 384], sizes = [8, 128], strides = [1, 1]} : vector<8x512xf32> to vector<8x128xf32>
    %168 = math.tanh %167 : vector<8x128xf32>
    %169 = vector.extract_strided_slice %166 {offsets = [0, 0], sizes = [8, 128], strides = [1, 1]} : vector<8x384xf32> to vector<8x128xf32>
    %170 = vector.extract_strided_slice %166 {offsets = [0, 128], sizes = [8, 128], strides = [1, 1]} : vector<8x384xf32> to vector<8x128xf32>
    %171 = vector.extract_strided_slice %166 {offsets = [0, 256], sizes = [8, 128], strides = [1, 1]} : vector<8x384xf32> to vector<8x128xf32>
    %172 = arith.mulf %170, %150 : vector<8x128xf32>
    %173 = arith.mulf %169, %168 : vector<8x128xf32>
    %174 = arith.addf %172, %173 : vector<8x128xf32>
    %175 = math.tanh %174 : vector<8x128xf32>
    %176 = arith.mulf %171, %175 : vector<8x128xf32>
    %c7_i32 = arith.constant 7 : i32
    %c8_i32_52 = arith.constant 8 : i32
    %177 = arith.muli %c7_i32, %c8_i32_52 : i32
    %178 = tpu.assume_multiple %177, 8 : i32
    %179 = arith.index_cast %178 : i32 to index
    %c0_53 = arith.constant 0 : index
    %180 = vector.load %arg9[%179, %c0_53] : memref<64x512xf32, #tpu.memory_space<vmem>>, vector<8x512xf32>
    %181 = arith.truncf %176 : vector<8x128xf32> to vector<8x128xbf16>
    %c0_54 = arith.constant 0 : index
    %c0_55 = arith.constant 0 : index
    %182 = vector.load %arg4[%c0_54, %c0_55] : memref<128x512xbf16, #tpu.memory_space<vmem>>, vector<128x512xbf16>
    %cst_56 = arith.constant dense<0.000000e+00> : vector<8x512xf32>
    %183 = tpu.matmul %181, %182, %cst_56 {dimension_numbers = #tpu.dot_dimension_numbers<[1], [0], [0], [1], [0, 0, 1, 1], [], []>} : vector<8x128xbf16>, vector<128x512xbf16>, vector<8x512xf32> -> vector<8x512xf32>
    %184 = arith.addf %180, %183 : vector<8x512xf32>
    %185 = vector.extract_strided_slice %184 {offsets = [0, 0], sizes = [8, 384], strides = [1, 1]} : vector<8x512xf32> to vector<8x384xf32>
    %186 = arith.negf %185 : vector<8x384xf32>
    %187 = math.exp %186 : vector<8x384xf32>
    %cst_57 = arith.constant 1.000000e+00 : f32
    %188 = vector.broadcast %cst_57 : f32 to vector<8x384xf32>
    %189 = arith.addf %188, %187 : vector<8x384xf32>
    %190 = arith.divf %188, %189 : vector<8x384xf32>
    %191 = vector.extract_strided_slice %184 {offsets = [0, 384], sizes = [8, 128], strides = [1, 1]} : vector<8x512xf32> to vector<8x128xf32>
    %192 = math.tanh %191 : vector<8x128xf32>
    %193 = vector.extract_strided_slice %190 {offsets = [0, 0], sizes = [8, 128], strides = [1, 1]} : vector<8x384xf32> to vector<8x128xf32>
    %194 = vector.extract_strided_slice %190 {offsets = [0, 128], sizes = [8, 128], strides = [1, 1]} : vector<8x384xf32> to vector<8x128xf32>
    %195 = vector.extract_strided_slice %190 {offsets = [0, 256], sizes = [8, 128], strides = [1, 1]} : vector<8x384xf32> to vector<8x128xf32>
    %196 = arith.mulf %194, %174 : vector<8x128xf32>
    %197 = arith.mulf %193, %192 : vector<8x128xf32>
    %198 = arith.addf %196, %197 : vector<8x128xf32>
    %199 = math.tanh %198 : vector<8x128xf32>
    %200 = arith.mulf %195, %199 : vector<8x128xf32>
    %c7_i32_58 = arith.constant 7 : i32
    %201 = arith.truncf %200 : vector<8x128xf32> to vector<8x128xbf16>
    %c0_59 = arith.constant 0 : index
    %c0_60 = arith.constant 0 : index
    %202 = vector.load %arg6[%c0_59, %c0_60] : memref<128x5xbf16, #tpu.memory_space<vmem>>, vector<128x5xbf16>
    %cst_61 = arith.constant dense<0.000000e+00> : vector<8x5xf32>
    %203 = tpu.matmul %201, %202, %cst_61 {dimension_numbers = #tpu.dot_dimension_numbers<[1], [0], [0], [1], [0, 0, 1, 1], [], []>} : vector<8x128xbf16>, vector<128x5xbf16>, vector<8x5xf32> -> vector<8x5xf32>
    %c0_62 = arith.constant 0 : index
    %c0_63 = arith.constant 0 : index
    %204 = vector.load %arg7[%c0_62, %c0_63] : memref<1x5xf32, #tpu.memory_space<vmem>>, vector<1x5xf32>
    %205 = vector.broadcast %204 : vector<1x5xf32> to vector<8x5xf32>
    %206 = arith.addf %203, %205 : vector<8x5xf32>
    %207 = tpu.iota {dimensions = array<i32: 1>} : vector<8x5xi32>
    %c3_i32_64 = arith.constant 3 : i32
    %208 = vector.broadcast %c3_i32_64 : i32 to vector<8x5xi32>
    %209 = arith.cmpi slt, %207, %208 : vector<8x5xi32>
    %cst_65 = arith.constant 0xFF800000 : f32
    %210 = vector.broadcast %cst_65 : f32 to vector<8x5xf32>
    %211 = arith.select %209, %206, %210 : vector<8x5xi1>, vector<8x5xf32>
    %cst_66 = arith.constant dense<0xFF800000> : vector<8xf32>
    %212 = vector.multi_reduction <maximumf>, %211, %cst_66 [1] : vector<8x5xf32> to vector<8xf32>
    %213 = vector.shape_cast %212 : vector<8xf32> to vector<8x1xf32>
    %cst_67 = arith.constant 0xFF800000 : f32
    %214 = vector.broadcast %cst_67 : f32 to vector<8x5xf32>
    %215 = arith.select %209, %214, %206 : vector<8x5xi1>, vector<8x5xf32>
    %cst_68 = arith.constant dense<0xFF800000> : vector<8xf32>
    %216 = vector.multi_reduction <maximumf>, %215, %cst_68 [1] : vector<8x5xf32> to vector<8xf32>
    %217 = vector.shape_cast %216 : vector<8xf32> to vector<8x1xf32>
    %218 = vector.shape_cast %213 : vector<8x1xf32> to vector<8x1xf32>
    %219 = vector.broadcast %218 : vector<8x1xf32> to vector<8x5xf32>
    %220 = vector.shape_cast %217 : vector<8x1xf32> to vector<8x1xf32>
    %221 = vector.broadcast %220 : vector<8x1xf32> to vector<8x5xf32>
    %222 = arith.select %209, %219, %221 : vector<8x5xi1>, vector<8x5xf32>
    %223 = arith.subf %206, %222 : vector<8x5xf32>
    %224 = math.exp %223 : vector<8x5xf32>
    %cst_69 = arith.constant 0.000000e+00 : f32
    %225 = vector.broadcast %cst_69 : f32 to vector<8x5xf32>
    %226 = arith.select %209, %224, %225 : vector<8x5xi1>, vector<8x5xf32>
    %cst_70 = arith.constant dense<0.000000e+00> : vector<8xf32>
    %227 = vector.multi_reduction <add>, %226, %cst_70 [1] : vector<8x5xf32> to vector<8xf32>
    %228 = vector.shape_cast %227 : vector<8xf32> to vector<8x1xf32>
    %cst_71 = arith.constant 0.000000e+00 : f32
    %229 = vector.broadcast %cst_71 : f32 to vector<8x5xf32>
    %230 = arith.select %209, %229, %224 : vector<8x5xi1>, vector<8x5xf32>
    %cst_72 = arith.constant dense<0.000000e+00> : vector<8xf32>
    %231 = vector.multi_reduction <add>, %230, %cst_72 [1] : vector<8x5xf32> to vector<8xf32>
    %232 = vector.shape_cast %231 : vector<8xf32> to vector<8x1xf32>
    %233 = vector.shape_cast %228 : vector<8x1xf32> to vector<8x1xf32>
    %234 = vector.broadcast %233 : vector<8x1xf32> to vector<8x5xf32>
    %235 = vector.shape_cast %232 : vector<8x1xf32> to vector<8x1xf32>
    %236 = vector.broadcast %235 : vector<8x1xf32> to vector<8x5xf32>
    %237 = arith.select %209, %234, %236 : vector<8x5xi1>, vector<8x5xf32>
    %238 = tpu.reciprocal %237 {approx = true} : vector<8x5xf32> -> vector<8x5xf32>
    %239 = arith.mulf %224, %238 : vector<8x5xf32>
    %c0_73 = arith.constant 0 : index
    %c0_74 = arith.constant 0 : index
    %240 = vector.load %arg8[%c0_73, %c0_74] : memref<8x5xf32, #tpu.memory_space<vmem>>, vector<8x5xf32>
    tpu.vector_store %arg8[%c0_73, %c0_74], %239 {strides = array<i32>} : memref<8x5xf32, #tpu.memory_space<vmem>>, vector<8x5xf32>,
    return
  }
}

</mosaic_0001>

<bundles_post_ra>
// kernel: maneuver_forward.1
= control target key start
LH: loop header
LB: loop body
LE: loop exit
PB: predicated region body
PF: predicated region fallthrough
CT: control target
= control target key end

     0   :  { %13 = vsyncpa [#allocation4], 0  ;;  %s2142_s30 = smov [#allocation3]   ;;  %s2143_s10 = smov 256   ;;  %s2823_s0 = inlined_call_operand.vmem [shape: f32[64,16], index: 0, kind: input, shape index: {}]   ;;  %s2824_s1 = inlined_call_operand.vmem [shape: bf16[16,64], index: 1, kind: input, shape index: {}]   ;;  %s2825_s2 = inlined_call_operand.vmem [shape: f32[1,64], index: 2, kind: input, shape index: {}]   ;;  %s2826_s3 = inlined_call_operand.vmem [shape: bf16[64,512], index: 3, kind: input, shape index: {}]   ;;  %s2827_s4 = inlined_call_operand.hbm [shape: bf16[128,512], index: 4, kind: input, shape index: {}]   ;;  %s2828_s5 = inlined_call_operand.vmem [shape: f32[1,512], index: 5, kind: input, shape index: {}]   ;;  %s2829_s6 = inlined_call_operand.vmem [shape: bf16[128,5], index: 6, kind: input, shape index: {}]   ;;  %s2830_s7 = inlined_call_operand.vmem [shape: f32[1,5], index: 7, kind: input, shape index: {}]   ;;  %s2831_s8 = inlined_call_operand.vmem [shape: f32[8,5], index: 8, kind: output, shape index: {}]  }
   0x1   :  { %s26_s29 = sshll.u32 %s2827_s4, 4  ;;  %s28_s9 = sshll.u32 %s2142_s30, 4  ;;  %s27_s29 = int_to_ptr.hbm [resolvable:$true] %s26_s29  ;;  %s29_s9 = int_to_ptr.vmem [resolvable:$true] %s28_s9 }
   0x2   :  { %s2144_s11 = smov 16  }
   0x3   :  { %34 = dma.hbm_to_vmem [thread:$0]  %s27_s29, 4096, %s29_s9, [#allocation4], %s2143_s10, %s2143_s10, %s2144_s11  }
   0x4   :  { %2140 = dma.done.wait [#allocation4], 4096  }
   0x5   :  { %2141 = vsyncadd [#allocation4], 4294963200  ;;  %v1926_v0 = vld [vmem:[%s2824_s1] sm:$0xff]  ;;  %v47_v2 = vld [vmem:[%s2823_s0 + $0x8] sm:$0xff]  ;;  %vm70_vm0 = vcmask 130048   ;;  %vm246_vm3 = vcmask 523264  }
   0x6   :  { %v46_v1 = vld [vmem:[%s2823_s0] sm:$0xff]  ;;  %v1940_v4 = vld [vmem:[%s2826_s3 + $0x6c] sm:$0xf]  ;;  %90 = vmatpush.bf16.msra.mxu0 %v1926_v0  ;;  %v1723_v5 = vld [vmem:[%s2826_s3 + $0x78] sm:$0xf0] }
   0x7   :  { %v54_v3 = vpack.c.bf16 %v47_v2, %v46_v1  ;;  %v1726_v6 = vor.u32 %v1940_v4, %v1723_v5  ;;  %v1936_v7 = vld [vmem:[%s2826_s3 + $0x4c] sm:$0xf]  ;;  %v1707_v8 = vld [vmem:[%s2826_s3 + $0x58] sm:$0xf0]  ;;  %v48_v10 = vld [vmem:[%s2823_s0 + $0x10] sm:$0xff] }
   0x8   :  { %v1710_v9 = vor.u32 %v1936_v7, %v1707_v8  ;;  %v49_v11 = vld [vmem:[%s2823_s0 + $0x18] sm:$0xff]  ;;  %v50_v13 = vld [vmem:[%s2823_s0 + $0x20] sm:$0xff]  ;;  %v51_v14 = vld [vmem:[%s2823_s0 + $0x28] sm:$0xff] }
   0x9   :  { %1659 = vmatmul.msk.bf16.vlgmr.msra.gmra.mxu0 %vm70_vm0, %v54_v3  ;;  %v55_v12 = vpack.c.bf16 %v49_v11, %v48_v10  ;;  %v56_v15 = vpack.c.bf16 %v51_v14, %v50_v13  ;;  %v52_v16 = vld [vmem:[%s2823_s0 + $0x30] sm:$0xff]  ;;  %v53_v17 = vld [vmem:[%s2823_s0 + $0x38] sm:$0xff]  ;;  %v1713_v19 = vld [vmem:[%s2826_s3 + $0x60] sm:$0xf] }
   0xa   :  { %350 = vmatpush.bf16.msrb.mxu0 %v1726_v6  ;;  %v57_v18 = vpack.c.bf16 %v53_v17, %v52_v16  ;;  %v1941_v20 = vld [vmem:[%s2826_s3 + $0x6c] sm:$0xf0]  ;;  %v1939_v21 = vld [vmem:[%s2826_s3 + $0x64] sm:$0xf]  ;;  %v1715_v23 = vld [vmem:[%s2826_s3 + $0x70] sm:$0xf0] }
   0xb   :  { %v1714_v22 = vor.u32 %v1941_v20, %v1713_v19  ;;  %v1721_v24 = vld [vmem:[%s2826_s3 + $0x68] sm:$0xf]  ;;  %v1942_v25 = vld [vmem:[%s2826_s3 + $0x74] sm:$0xf0]  ;;  %v1718_v26 = vor.u32 %v1939_v21, %v1715_v23  ;;  %v1697_v28 = vld [vmem:[%s2826_s3 + $0x40] sm:$0xf] }
   0xc   :  { %v1722_v27 = vor.u32 %v1942_v25, %v1721_v24  ;;  %v1937_v29 = vld [vmem:[%s2826_s3 + $0x4c] sm:$0xf0]  ;;  %v1935_v30 = vld [vmem:[%s2826_s3 + $0x44] sm:$0xf]  ;;  %v1699_v32 = vld [vmem:[%s2826_s3 + $0x50] sm:$0xf0] }
   0xd   :  { %263 = vmatpush.bf16.msra.mxu1 %v1714_v22  ;;  %292 = vmatpush.bf16.msra.mxu2 %v1718_v26  ;;  %v1698_v31 = vor.u32 %v1937_v29, %v1697_v28  ;;  %v1705_v33 = vld [vmem:[%s2826_s3 + $0x48] sm:$0xf]  ;;  %v1938_v34 = vld [vmem:[%s2826_s3 + $0x54] sm:$0xf0]  ;;  %v1702_v35 = vor.u32 %v1935_v30, %v1699_v32  ;;  %v1932_v37 = vld [vmem:[%s2826_s3 + $0x2c] sm:$0xf] }
   0xe   :  { %351 = vmatpush.bf16.msrb.mxu0 %v1710_v9  ;;  %321 = vmatpush.bf16.msra.mxu3 %v1722_v27  ;;  %v1706_v36 = vor.u32 %v1938_v34, %v1705_v33  ;;  %v1691_v38 = vld [vmem:[%s2826_s3 + $0x38] sm:$0xf0]  ;;  %v1681_v40 = vld [vmem:[%s2826_s3 + $0x20] sm:$0xf]  ;;  %v1933_v41 = vld [vmem:[%s2826_s3 + $0x2c] sm:$0xf0] }
   0xf   :  { %v1694_v39 = vor.u32 %v1932_v37, %v1691_v38  ;;  %v1931_v42 = vld [vmem:[%s2826_s3 + $0x24] sm:$0xf]  ;;  %v1682_v43 = vor.u32 %v1933_v41, %v1681_v40  ;;  %v1683_v44 = vld [vmem:[%s2826_s3 + $0x30] sm:$0xf0]  ;;  %v1689_v45 = vld [vmem:[%s2826_s3 + $0x28] sm:$0xf] }
  0x10   :  { %v1934_v46 = vld [vmem:[%s2826_s3 + $0x34] sm:$0xf0]  ;;  %v1686_v47 = vor.u32 %v1931_v42, %v1683_v44  ;;  %v1665_v49 = vld [vmem:[%s2826_s3] sm:$0xf]  ;;  %v1929_v50 = vld [vmem:[%s2826_s3 + $0xc] sm:$0xf0] }
  0x11   :  { %264 = vmatpush.bf16.msra.mxu1 %v1698_v31  ;;  %293 = vmatpush.bf16.msra.mxu2 %v1702_v35  ;;  %v1690_v48 = vor.u32 %v1934_v46, %v1689_v45  ;;  %v1927_v51 = vld [vmem:[%s2826_s3 + $0x4] sm:$0xf]  ;;  %v1666_v52 = vor.u32 %v1929_v50, %v1665_v49  ;;  %v1667_v53 = vld [vmem:[%s2826_s3 + $0x10] sm:$0xf0]  ;;  %v1673_v54 = vld [vmem:[%s2826_s3 + $0x8] sm:$0xf] }
  0x12   :  { %322 = vmatpush.bf16.msra.mxu3 %v1706_v36  ;;  %352 = vmatpush.bf16.msrb.mxu0 %v1694_v39  ;;  %v1930_v55 = vld [vmem:[%s2826_s3 + $0x14] sm:$0xf0]  ;;  %v1670_v56 = vor.u32 %v1927_v51, %v1667_v53  ;;  %v1928_v58 = vld [vmem:[%s2826_s3 + $0xc] sm:$0xf]  ;;  %v1675_v59 = vld [vmem:[%s2826_s3 + $0x18] sm:$0xf0] }
  0x13   :  { %v1674_v57 = vor.u32 %v1930_v55, %v1673_v54  ;;  %v1678_v60 = vor.u32 %v1928_v58, %v1675_v59  ;;  %v2323_v62 = vld [vmem:[%s2825_s2] ss:$0 sm:$0xff]  ;;  %v1971_v7 = vld [vmem:[#allocation3 + $0xe4] sm:$0xf]  ;;  %v1861_v8 = vld [vmem:[#allocation3 + $0xf0] sm:$0xf0] }
  0x14   :  { %v2327_v9 = vor.u32 %v1971_v7, %v1861_v8  ;;  %v1859_v28 = vld [vmem:[#allocation3 + $0xe0] sm:$0xf]  ;;  %v1973_v29 = vld [vmem:[#allocation3 + $0xec] sm:$0xf0]  ;;  %v1967_v30 = vld [vmem:[#allocation3 + $0xc4] sm:$0xf] }
  0x15   :  { %265 = vmatpush.bf16.msra.mxu1 %v1682_v43  ;;  %294 = vmatpush.bf16.msra.mxu2 %v1686_v47  ;;  %v2346_v31 = vor.u32 %v1973_v29, %v1859_v28  ;;  %v1845_v32 = vld [vmem:[#allocation3 + $0xd0] sm:$0xf0]  ;;  %v1867_v33 = vld [vmem:[#allocation3 + $0xe8] sm:$0xf]  ;;  %v1974_v34 = vld [vmem:[#allocation3 + $0xf4] sm:$0xf0] }
  0x16   :  { %323 = vmatpush.bf16.msra.mxu3 %v1690_v48  ;;  %353 = vmatpush.bf16.msrb.mxu0 %v1678_v60  ;;  %v2348_v35 = vor.u32 %v1967_v30, %v1845_v32  ;;  %v2350_v36 = vor.u32 %v1974_v34, %v1867_v33  ;;  %v1843_v37 = vld [vmem:[#allocation3 + $0xc0] sm:$0xf]  ;;  %v1969_v38 = vld [vmem:[#allocation3 + $0xcc] sm:$0xf0]  ;;  %v1963_v39 = vld [vmem:[#allocation3 + $0xa4] sm:$0xf] }
  0x17   :  { %v2356_v40 = vor.u32 %v1969_v38, %v1843_v37  ;;  %v1829_v41 = vld [vmem:[#allocation3 + $0xb0] sm:$0xf0]  ;;  %v1851_v42 = vld [vmem:[#allocation3 + $0xc8] sm:$0xf]  ;;  %v1970_v43 = vld [vmem:[#allocation3 + $0xd4] sm:$0xf0] }
  0x18   :  { %v2358_v44 = vor.u32 %v1963_v39, %v1829_v41  ;;  %v2360_v45 = vor.u32 %v1970_v43, %v1851_v42  ;;  %v1827_v55 = vld [vmem:[#allocation3 + $0xa0] sm:$0xf]  ;;  %v1961_v59 = vld [vmem:[#allocation3 + $0x8c] sm:$0xf0]  ;;  %v1959_v8 = vld [vmem:[#allocation3 + $0x84] sm:$0xf] }
  0x19   :  { %1660 = vmatmul.msk.bf16.gmra.mxu0 %vm70_vm0, %v55_v12  ;;  %266 = vmatpush.bf16.msra.mxu1 %v1666_v52  ;;  %v1811_v58 = vld [vmem:[#allocation3 + $0x80] sm:$0xf]  ;;  %v1949_v7 = vld [vmem:[#allocation3 + $0x2c] sm:$0xf0]  ;;  %v1951_v32 = vld [vmem:[#allocation3 + $0x44] sm:$0xf] }
  0x1a   :  { %295 = vmatpush.bf16.msra.mxu2 %v1670_v56  ;;  %324 = vmatpush.bf16.msra.mxu3 %v1674_v57  ;;  %v1965_v56 = vld [vmem:[#allocation3 + $0xac] sm:$0xf0]  ;;  %v2375_v60 = vor.u32 %v1961_v59, %v1811_v58  ;;  %v1781_v33 = vld [vmem:[#allocation3 + $0x50] sm:$0xf0]  ;;  %v1787_v34 = vld [vmem:[#allocation3 + $0x48] sm:$0xf] }
  0x1b   :  { %805 = vmatpush.bf16.msra.mxu0 %v2350_v36  ;;  %v2372_v57 = vor.u32 %v1965_v56, %v1827_v55  ;;  %v2421_v38 = vor.u32 %v1951_v32, %v1781_v33  ;;  %v1954_v39 = vld [vmem:[#allocation3 + $0x54] sm:$0xf0]  ;;  %v1968_v41 = vld [vmem:[#allocation3 + $0xcc] sm:$0xf]  ;;  %v1853_v42 = vld [vmem:[#allocation3 + $0xd8] sm:$0xf0] }
  0x1c   :  { %v1964_v58 = vld [vmem:[#allocation3 + $0xac] sm:$0xf]  ;;  %v1837_v59 = vld [vmem:[#allocation3 + $0xb8] sm:$0xf0] }
  0x1d   :  { %652 = vmatpush.bf16.msrb.mxu1 %v2346_v31  ;;  %v1948_v33 = vld [vmem:[#allocation3 + $0x2c] sm:$0xf] }
  0x1e   :  { %665 = vmatpush.bf16.msrb.mxu2 %v2327_v9  ;;  %678 = vmatpush.bf16.msrb.mxu3 %v2350_v36 }
  0x1f   :  { %806 = vmatpush.bf16.msra.mxu0 %v2360_v45 }
  0x21   :  { %653 = vmatpush.bf16.msrb.mxu1 %v2356_v40 }
  0x22   :  { %666 = vmatpush.bf16.msrb.mxu2 %v2348_v35  ;;  %679 = vmatpush.bf16.msrb.mxu3 %v2360_v45 }
  0x25   :  { %654 = vmatpush.bf16.msrb.mxu1 %v2372_v57 }
  0x26   :  { %667 = vmatpush.bf16.msrb.mxu2 %v2358_v44 }
  0x29   :  { %1661 = vmatmul.msk.bf16.gmra.mxu0 %vm70_vm0, %v56_v15  ;;  %655 = vmatpush.bf16.msrb.mxu1 %v2375_v60 }
  0x39   :  { %1662 = vmatmul.msk.bf16.gmra.mxu0 %vm70_vm0, %v57_v18 }
  0x86   :  { %v92_v61 = vpop.f32.mrf.mxu0 }
  0x87   :  { %v93_v63 = vadd.f32 %v2323_v62, %v92_v61  ;;  %v1795_v61 = vld [vmem:[#allocation3 + $0x60] sm:$0xf] }
  0x89   :  { %v120_v1 = vmul.f32 0.1, %v93_v63  ;;  %vm112_vm1 = vcmp.gt.f32.partialorder %v93_v63, 0.0 }
  0x8b   :  { %v128_v4 = vsel %vm112_vm1, %v93_v63, %v120_v1  ;;  %v1953_v1 = vld [vmem:[#allocation3 + $0x4c] sm:$0xf0] }
  0x8e   :  { %v94_v0 = vpop.f32.mrf.mxu0 }
  0x8f   :  { %v95_v2 = vadd.f32 %v2323_v62, %v94_v0  ;;  %v1779_v0 = vld [vmem:[#allocation3 + $0x40] sm:$0xf] }
  0x91   :  { %vm113_vm2 = vcmp.gt.f32.partialorder %v95_v2, 0.0  ;;  %v121_v3 = vmul.f32 0.1, %v95_v2 }
  0x93   :  { %v129_v5 = vsel %vm113_vm2, %v95_v2, %v121_v3  ;;  %v1835_v2 = vld [vmem:[#allocation3 + $0xa8] sm:$0xf]  ;;  %v1966_v3 = vld [vmem:[#allocation3 + $0xb4] sm:$0xf0] }
  0x94   :  { %v136_v6 = vpack.c.bf16 %v129_v5, %v128_v4  ;;  %v2381_v4 = vor.u32 %v1953_v1, %v1779_v0  ;;  %v2383_v5 = vor.u32 %v1966_v3, %v1835_v2  ;;  %v1946_v0 = vld [vmem:[#allocation3 + $0x14] sm:$0xf0]  ;;  %v1960_v1 = vld [vmem:[#allocation3 + $0x8c] sm:$0xf]  ;;  %v1821_v2 = vld [vmem:[#allocation3 + $0x98] sm:$0xf0] }
  0x96   :  { %1727 = vmatmul.msk.bf16.vlgmr.msra.gmra.mxu1 %vm246_vm3, %v136_v6  ;;  %1731 = vmatmul.msk.bf16.vlgmr.msra.gmra.mxu2 %vm246_vm3, %v136_v6  ;;  %v97_v10 = vpop.f32.mrf.mxu0 }
  0x97   :  { %1735 = vmatmul.msk.bf16.vlgmr.msra.gmra.mxu3 %vm246_vm3, %v136_v6  ;;  %1739 = vmatmul.msk.bf16.vlgmr.msrb.gmra.mxu0 %vm246_vm3, %v136_v6  ;;  %v98_v11 = vadd.f32 %v2323_v62, %v97_v10  ;;  %v1763_v6 = vld [vmem:[#allocation3 + $0x20] sm:$0xf]  ;;  %v1813_v10 = vld [vmem:[#allocation3 + $0x90] sm:$0xf0] }
  0x98   :  { %680 = vmatpush.bf16.msrb.mxu3 %v2383_v5  ;;  %807 = vmatpush.bf16.msra.mxu0 %v2383_v5 }
  0x99   :  { %v122_v12 = vmul.f32 0.1, %v98_v11  ;;  %vm114_vm4 = vcmp.gt.f32.partialorder %v98_v11, 0.0 }
  0x9b   :  { %v130_v15 = vsel %vm114_vm4, %v98_v11, %v122_v12  ;;  %v1819_v11 = vld [vmem:[#allocation3 + $0x88] sm:$0xf]  ;;  %v2388_v12 = vor.u32 %v1949_v7, %v1763_v6 }
  0x9e   :  { %v99_v13 = vpop.f32.mrf.mxu0 }
  0x9f   :  { %v100_v14 = vadd.f32 %v2323_v62, %v99_v13  ;;  %v2390_v13 = vor.u32 %v1959_v8, %v1813_v10  ;;  %v2446_v10 = vor.u32 %v1960_v1, %v1821_v2 }
  0xa1   :  { %vm115_vm5 = vcmp.gt.f32.partialorder %v100_v14, 0.0  ;;  %v123_v16 = vmul.f32 0.1, %v100_v14  ;;  %668 = vmatpush.bf16.msrb.mxu2 %v2390_v13 }
  0xa3   :  { %v131_v17 = vsel %vm115_vm5, %v100_v14, %v123_v16  ;;  %v1962_v14 = vld [vmem:[#allocation3 + $0x94] sm:$0xf0]  ;;  %v2398_v16 = vld [vmem:[%s2828_s5] sm:$0xf] }
  0xa4   :  { %v137_v18 = vpack.c.bf16 %v131_v17, %v130_v15  ;;  %v2392_v15 = vor.u32 %v1962_v14, %v1819_v11  ;;  %v1747_v17 = vld [vmem:[#allocation3] sm:$0xf]  ;;  %v2416_v30 = vperm.slane %v2398_v16, 2  ;;  %v2463_v32 = vperm.slane %v2398_v16, 3 }
  0xa6   :  { %v102_v19 = vpop.f32.mrf.mxu0  ;;  %1728 = vmatmul.msk.bf16.gmra.mxu1 %vm246_vm3, %v137_v18  ;;  %1732 = vmatmul.msk.bf16.gmra.mxu2 %vm246_vm3, %v137_v18  ;;  %2834 = vst [vmem:[#allocation6_spill] sm:$0xff] %v2463_v32 }
  0xa7   :  { %1736 = vmatmul.msk.bf16.gmra.mxu3 %vm246_vm3, %v137_v18  ;;  %1740 = vmatmul.msk.bf16.gmra.mxu0 %vm246_vm3, %v137_v18  ;;  %v103_v20 = vadd.f32 %v2323_v62, %v102_v19  ;;  %v1945_v18 = vld [vmem:[#allocation3 + $0xc] sm:$0xf0]  ;;  %v1955_v19 = vld [vmem:[#allocation3 + $0x64] sm:$0xf] }
  0xa8   :  { %681 = vmatpush.bf16.msrb.mxu3 %v2392_v15  ;;  %808 = vmatpush.bf16.msra.mxu0 %v2392_v15 }
  0xa9   :  { %v124_v21 = vmul.f32 0.1, %v103_v20  ;;  %vm116_vm6 = vcmp.gt.f32.partialorder %v103_v20, 0.0 }
  0xab   :  { %v132_v24 = vsel %vm116_vm6, %v103_v20, %v124_v21  ;;  %v1797_v20 = vld [vmem:[#allocation3 + $0x70] sm:$0xf0]  ;;  %v1803_v21 = vld [vmem:[#allocation3 + $0x68] sm:$0xf] }
  0xae   :  { %v104_v22 = vpop.f32.mrf.mxu0 }
  0xaf   :  { %v105_v23 = vadd.f32 %v2323_v62, %v104_v22  ;;  %v2402_v22 = vor.u32 %v1945_v18, %v1747_v17 }
  0xb1   :  { %vm117_vm7 = vcmp.gt.f32.partialorder %v105_v23, 0.0  ;;  %v125_v25 = vmul.f32 0.1, %v105_v23 }
  0xb3   :  { %v133_v26 = vsel %vm117_vm7, %v105_v23, %v125_v25  ;;  %v2405_v23 = vor.u32 %v1955_v19, %v1797_v20  ;;  %v1972_v25 = vld [vmem:[#allocation3 + $0xec] sm:$0xf]  ;;  %v1805_v20 = vld [vmem:[#allocation3 + $0x78] sm:$0xf0] }
  0xb4   :  { %v138_v27 = vpack.c.bf16 %v133_v26, %v132_v24  ;;  %v1958_v24 = vld [vmem:[#allocation3 + $0x74] sm:$0xf0]  ;;  %v1869_v26 = vld [vmem:[#allocation3 + $0xf8] sm:$0xf0]  ;;  %v1956_v19 = vld [vmem:[#allocation3 + $0x6c] sm:$0xf] }
  0xb5   :  { %v2410_v28 = vor.u32 %v1958_v24, %v1803_v21  ;;  %v2413_v29 = vor.u32 %v1972_v25, %v1869_v26  ;;  %669 = vmatpush.bf16.msrb.mxu2 %v2405_v23  ;;  %v2455_v21 = vor.u32 %v1956_v19, %v1805_v20  ;;  %v1952_v24 = vld [vmem:[#allocation3 + $0x4c] sm:$0xf]  ;;  %v1789_v25 = vld [vmem:[#allocation3 + $0x58] sm:$0xf0] }
  0xb6   :  { %1729 = vmatmul.msk.bf16.gmra.mxu1 %vm246_vm3, %v138_v27  ;;  %1733 = vmatmul.msk.bf16.gmra.mxu2 %vm246_vm3, %v138_v27  ;;  %v107_v46 = vpop.f32.mrf.mxu0  ;;  %v2460_v26 = vor.u32 %v1952_v24, %v1789_v25 }
  0xb7   :  { %1737 = vmatmul.msk.bf16.gmra.mxu3 %vm246_vm3, %v138_v27  ;;  %1741 = vmatmul.msk.bf16.gmra.mxu0 %vm246_vm3, %v138_v27  ;;  %v108_v47 = vadd.f32 %v2323_v62, %v107_v46  ;;  %v2408_v27 = vperm.slane %v2398_v16, 0  ;;  %v1947_v46 = vld [vmem:[#allocation3 + $0x24] sm:$0xf] }
  0xb8   :  { %682 = vmatpush.bf16.msrb.mxu3 %v2410_v28  ;;  %809 = vmatpush.bf16.msra.mxu0 %v2410_v28 }
  0xb9   :  { %v126_v48 = vmul.f32 0.1, %v108_v47  ;;  %vm118_vm8 = vcmp.gt.f32.partialorder %v108_v47, 0.0  ;;  %670 = vmatpush.bf16.msrb.mxu2 %v2421_v38 }
  0xbb   :  { %v134_v51 = vsel %vm118_vm8, %v108_v47, %v126_v48  ;;  %v1765_v47 = vld [vmem:[#allocation3 + $0x30] sm:$0xf0]  ;;  %v2425_v48 = vor.u32 %v1954_v39, %v1787_v34  ;;  %v1773_v34 = vld [vmem:[#allocation3 + $0x38] sm:$0xf0] }
  0xbd   :  { %683 = vmatpush.bf16.msrb.mxu3 %v2425_v48  ;;  %810 = vmatpush.bf16.msra.mxu0 %v2425_v48 }
  0xbe   :  { %v109_v49 = vpop.f32.mrf.mxu0 }
  0xbf   :  { %v110_v50 = vadd.f32 %v2323_v62, %v109_v49  ;;  %v1957_v62 = vld [vmem:[#allocation3 + $0x6c] sm:$0xf0]  ;;  %v2427_v49 = vor.u32 %v1968_v41, %v1853_v42  ;;  %v2469_v42 = vor.u32 %v1948_v33, %v1773_v34 }
  0xc0   :  { %v2378_v63 = vor.u32 %v1957_v62, %v1795_v61  ;;  %v2436_v61 = vor.u32 %v1964_v58, %v1837_v59  ;;  %v1755_v62 = vld [vmem:[#allocation3 + $0x8] sm:$0xf] }
  0xc1   :  { %vm119_vm9 = vcmp.gt.f32.partialorder %v110_v50, 0.0  ;;  %v127_v52 = vmul.f32 0.1, %v110_v50  ;;  %v2444_v8 = vor.u32 %v1946_v0, %v1755_v62 }
  0xc2   :  { %656 = vmatpush.bf16.msrb.mxu1 %v2378_v63 }
  0xc3   :  { %v135_v53 = vsel %vm119_vm9, %v110_v50, %v127_v52  ;;  %v1943_v50 = vld [vmem:[#allocation3 + $0x4] sm:$0xf]  ;;  %v1749_v52 = vld [vmem:[#allocation3 + $0x10] sm:$0xf0] }
  0xc4   :  { %v139_v54 = vpack.c.bf16 %v135_v53, %v134_v51  ;;  %v2430_v51 = vor.u32 %v1947_v46, %v1765_v47  ;;  %v1771_v53 = vld [vmem:[#allocation3 + $0x28] sm:$0xf]  ;;  %v2440_v6 = vor.u32 %v1943_v50, %v1749_v52  ;;  %v1944_v47 = vld [vmem:[#allocation3 + $0xc] sm:$0xf]  ;;  %v1757_v50 = vld [vmem:[#allocation3 + $0x18] sm:$0xf0] }
  0xc6   :  { %1730 = vmatmul.msk.bf16.gmra.mxu1 %vm246_vm3, %v139_v54  ;;  %1734 = vmatmul.msk.bf16.gmra.mxu2 %vm246_vm3, %v139_v54 }
  0xc7   :  { %1738 = vmatmul.msk.bf16.gmra.mxu3 %vm246_vm3, %v139_v54  ;;  %1742 = vmatmul.msk.bf16.gmra.mxu0 %vm246_vm3, %v139_v54  ;;  %v1950_v54 = vld [vmem:[#allocation3 + $0x34] sm:$0xf0] }
  0xc8   :  { %657 = vmatpush.bf16.msrb.mxu1 %v2381_v4  ;;  %v2434_v56 = vor.u32 %v1950_v54, %v1771_v53  ;;  %671 = vmatpush.bf16.msrb.mxu2 %v2430_v51  ;;  %v2476_v54 = vor.u32 %v1944_v47, %v1757_v50 }
  0xca   :  { %684 = vmatpush.bf16.msrb.mxu3 %v2434_v56  ;;  %811 = vmatpush.bf16.msra.mxu0 %v2434_v56 }
  0xcc   :  { %658 = vmatpush.bf16.msrb.mxu1 %v2388_v12  ;;  %672 = vmatpush.bf16.msrb.mxu2 %v2440_v6 }
  0xce   :  { %685 = vmatpush.bf16.msrb.mxu3 %v2444_v8  ;;  %812 = vmatpush.bf16.msra.mxu0 %v2444_v8 }
  0xd0   :  { %659 = vmatpush.bf16.msrb.mxu1 %v2402_v22  ;;  %779 = vmatpush.bf16.msra.mxu2 %v2346_v31 }
  0xd2   :  { %792 = vmatpush.bf16.msra.mxu3 %v2327_v9  ;;  %932 = vmatpush.bf16.msrb.mxu0 %v2350_v36 }
  0xd4   :  { %691 = vmatpush.bf16.msra.mxu1 %v2413_v29  ;;  %780 = vmatpush.bf16.msra.mxu2 %v2356_v40 }
  0xd6   :  { %793 = vmatpush.bf16.msra.mxu3 %v2348_v35  ;;  %933 = vmatpush.bf16.msrb.mxu0 %v2360_v45 }
  0xd8   :  { %692 = vmatpush.bf16.msra.mxu1 %v2427_v49  ;;  %781 = vmatpush.bf16.msra.mxu2 %v2372_v57 }
  0xda   :  { %794 = vmatpush.bf16.msra.mxu3 %v2358_v44  ;;  %934 = vmatpush.bf16.msrb.mxu0 %v2383_v5 }
  0xdc   :  { %693 = vmatpush.bf16.msra.mxu1 %v2436_v61  ;;  %782 = vmatpush.bf16.msra.mxu2 %v2375_v60 }
  0xde   :  { %795 = vmatpush.bf16.msra.mxu3 %v2390_v13  ;;  %935 = vmatpush.bf16.msrb.mxu0 %v2392_v15 }
  0xe0   :  { %694 = vmatpush.bf16.msra.mxu1 %v2446_v10  ;;  %783 = vmatpush.bf16.msra.mxu2 %v2378_v63 }
  0xe2   :  { %796 = vmatpush.bf16.msra.mxu3 %v2405_v23  ;;  %936 = vmatpush.bf16.msrb.mxu0 %v2410_v28 }
  0xe4   :  { %695 = vmatpush.bf16.msra.mxu1 %v2455_v21  ;;  %784 = vmatpush.bf16.msra.mxu2 %v2381_v4 }
  0xe6   :  { %797 = vmatpush.bf16.msra.mxu3 %v2421_v38  ;;  %937 = vmatpush.bf16.msrb.mxu0 %v2425_v48 }
  0xe8   :  { %696 = vmatpush.bf16.msra.mxu1 %v2460_v26  ;;  %785 = vmatpush.bf16.msra.mxu2 %v2388_v12 }
  0xea   :  { %798 = vmatpush.bf16.msra.mxu3 %v2430_v51  ;;  %938 = vmatpush.bf16.msrb.mxu0 %v2434_v56 }
  0xec   :  { %697 = vmatpush.bf16.msra.mxu1 %v2469_v42  ;;  %786 = vmatpush.bf16.msra.mxu2 %v2402_v22 }
  0xee   :  { %799 = vmatpush.bf16.msra.mxu3 %v2440_v6  ;;  %939 = vmatpush.bf16.msrb.mxu0 %v2444_v8 }
  0xf0   :  { %698 = vmatpush.bf16.msra.mxu1 %v2476_v54 }
 0x113   :  { %v268_v37 = vpop.f32.mrf.mxu1 }
 0x114   :  { %v269_v43 = vadd.f32 %v268_v37, %v2408_v27  ;;  %v355_v37 = vpop.f32.mrf.mxu0 }
 0x115   :  { %v356_v46 = vadd.f32 %v355_v37, %v2463_v32 }
 0x116   :  { %v1743_v55 = vmul.f32 -1.442695, %v269_v43 }
 0x118   :  { %1988 = vpow2.f32 %v1743_v55 }
 0x119   :  { %v297_v3 = vpop.f32.mrf.mxu2 }
 0x11a   :  { %v326_v7 = vpop.f32.mrf.mxu3 }
 0x11b   :  { %v327_v11 = vadd.f32 %v326_v7, %v2416_v30 }
 0x11d   :  { %v1744_v14 = vmul.f32 -1.442695, %v327_v11 }
 0x11e   :  { %v1989_v17 = vpop.eup %1988 }
 0x11f   :  { %v416_v18 = vadd.f32 1.0, %v1989_v17  ;;  %1990 = vpow2.f32 %v1744_v14 }
 0x121   :  { %1992 = vrcp.f32 %v416_v18  ;;  %v429_v55 = vand.u32 2147483648, %v416_v18  ;;  %v427_v59 = vand.u32 2147483647, %v416_v18  ;;  %vm423_vm11 = vweird.f32 %v416_v18 }
 0x122   :  { %v328_v47 = vpop.f32.mrf.mxu3 }
 0x123   :  { %v430_v1 = vor.u32 1.1754944e-38, %v429_v55  ;;  %vm428_vm13 = vcmp.eq.f32.partialorder %v427_v59, 8.507059e+37 }
 0x125   :  { %v1991_v39 = vpop.eup %1990 }
 0x126   :  { %v417_v41 = vadd.f32 1.0, %v1991_v39 }
 0x127   :  { %v1993_v43 = vpop.eup %1992 }
 0x128   :  { %v419_v52 = vmul.f32 %v1993_v43, %v416_v18  ;;  %1994 = vrcp.f32 %v417_v41  ;;  %vm424_vm10 = vweird.f32 %v1993_v43  ;;  %v444_v18 = vand.u32 2147483648, %v417_v41 }
 0x129   :  { %1996 = vtanh.f32 %v356_v46  ;;  %vm425_vm12 = vmor %vm423_vm11, %vm424_vm10  ;;  %vm438_vm15 = vweird.f32 %v417_v41  ;;  %v442_v24 = vand.u32 2147483647, %v417_v41  ;;  %v299_v46 = vpop.f32.mrf.mxu2 }
 0x12a   :  { %v420_v53 = vsub.f32 1.0, %v419_v52  ;;  %v445_v33 = vor.u32 1.1754944e-38, %v444_v18 }
 0x12b   :  { %vm443_vm1 = vcmp.eq.f32.partialorder %v442_v24, 8.507059e+37 }
 0x12c   :  { %v421_v58 = vmul.f32 %v1993_v43, %v420_v53  ;;  %v2533_v53 = vpop.f32.mrf.mxu3 }
 0x12e   :  { %v1995_v62 = vpop.eup %1994  ;;  %v422_v0 = vadd.f32 %v1993_v43, %v421_v58 }
 0x12f   :  { %v434_v2 = vmul.f32 %v1995_v62, %v417_v41  ;;  %v1997_v7 = vpop.eup %1996  ;;  %vm439_vm14 = vweird.f32 %v1995_v62 }
 0x130   :  { %v426_v3 = vsel %vm425_vm12, %v1993_v43, %v422_v0  ;;  %vm440_vm0 = vmor %vm438_vm15, %vm439_vm14  ;;  %v270_v43 = vpop.f32.mrf.mxu1 }
 0x131   :  { %v431_v11 = vsel %vm428_vm13, %v430_v1, %v426_v3  ;;  %v435_v14 = vsub.f32 1.0, %v434_v2  ;;  %v2531_v52 = vpop.f32.mrf.mxu2  ;;  %v271_v24 = vadd.f32 %v270_v43, %v2408_v27 }
 0x132   :  { %v2485_v17 = vmul.f32 %v1997_v7, %v431_v11 }
 0x133   :  { %v436_v19 = vmul.f32 %v1995_v62, %v435_v14 }
 0x134   :  { %1998 = vtanh.f32 %v2485_v17  ;;  %v2539_v59 = vpop.f32.mrf.mxu3 }
 0x135   :  { %v437_v20 = vadd.f32 %v1995_v62, %v436_v19  ;;  %2837 = vst [vmem:[#allocation9_spill] sm:$0xff] %v2539_v59 }
 0x137   :  { %v441_v25 = vsel %vm440_vm0, %v1995_v62, %v437_v20 }
 0x138   :  { %v446_v37 = vsel %vm443_vm1, %v445_v33, %v441_v25  ;;  %v2529_v50 = vpop.f32.mrf.mxu1 }
 0x139   :  { %v2537_v58 = vpop.f32.mrf.mxu2 }
 0x13a   :  { %v1999_v34 = vpop.eup %1998  ;;  %2836 = vst [vmem:[#allocation8_spill] sm:$0xff] %v2537_v58 }
 0x13b   :  { %v451_v39 = vmul.f32 %v1999_v34, %v446_v37  ;;  %v2567_v34 = vperm.slane %v2398_v16, 1 }
 0x13c   :  { %v2545_v1 = vpop.f32.mrf.mxu3 }
 0x13d   :  { %v459_v41 = vpack.c.bf16 %v451_v39, %v451_v39  ;;  %2840 = vst [vmem:[#allocation12_spill] sm:$0xff] %v2545_v1 }
 0x13f   :  { %660 = vmatmul.bf16.vlgmr.msrb.gmra.mxu1 %v459_v41  ;;  %673 = vmatmul.bf16.vlgmr.msrb.gmra.mxu2 %v459_v41 }
 0x140   :  { %686 = vmatmul.bf16.vlgmr.msrb.gmra.mxu3 %v459_v41  ;;  %818 = vmatpush.bf16.msrb.mxu1 %v2413_v29  ;;  %v2535_v55 = vpop.f32.mrf.mxu1 }
 0x141   :  { %906 = vmatpush.bf16.msrb.mxu2 %v2346_v31  ;;  %919 = vmatpush.bf16.msrb.mxu3 %v2327_v9  ;;  %2835 = vst [vmem:[#allocation7_spill] sm:$0xff] %v2535_v55  ;;  %v2543_v0 = vpop.f32.mrf.mxu2 }
 0x142   :  { %2839 = vst [vmem:[#allocation11_spill] sm:$0xff] %v2543_v0 }
 0x144   :  { %819 = vmatpush.bf16.msrb.mxu1 %v2427_v49  ;;  %v2551_v7 = vpop.f32.mrf.mxu3 }
 0x145   :  { %907 = vmatpush.bf16.msrb.mxu2 %v2356_v40  ;;  %920 = vmatpush.bf16.msrb.mxu3 %v2348_v35  ;;  %2843 = vst [vmem:[#allocation15_spill] sm:$0xff] %v2551_v7 }
 0x148   :  { %820 = vmatpush.bf16.msrb.mxu1 %v2436_v61  ;;  %v2541_v62 = vpop.f32.mrf.mxu1 }
 0x149   :  { %908 = vmatpush.bf16.msrb.mxu2 %v2372_v57  ;;  %921 = vmatpush.bf16.msrb.mxu3 %v2358_v44  ;;  %2838 = vst [vmem:[#allocation10_spill] sm:$0xff] %v2541_v62  ;;  %v2549_v3 = vpop.f32.mrf.mxu2 }
 0x14a   :  { %2842 = vst [vmem:[#allocation14_spill] sm:$0xff] %v2549_v3 }
 0x14c   :  { %821 = vmatpush.bf16.msrb.mxu1 %v2446_v10  ;;  %v2557_v19 = vpop.f32.mrf.mxu3 }
 0x14d   :  { %909 = vmatpush.bf16.msrb.mxu2 %v2375_v60  ;;  %922 = vmatpush.bf16.msrb.mxu3 %v2390_v13  ;;  %2846 = vst [vmem:[#allocation18_spill] sm:$0xff] %v2557_v19 }
 0x14f   :  { %699 = vmatmul.bf16.vlgmr.msra.gmra.mxu1 %v459_v41  ;;  %v300_v41 = vadd.f32 %v299_v46, %v2567_v34 }
 0x150   :  { %822 = vmatpush.bf16.msrb.mxu1 %v2455_v21  ;;  %v2547_v2 = vpop.f32.mrf.mxu1 }
 0x151   :  { %910 = vmatpush.bf16.msrb.mxu2 %v2378_v63  ;;  %923 = vmatpush.bf16.msrb.mxu3 %v2405_v23  ;;  %2841 = vst [vmem:[#allocation13_spill] sm:$0xff] %v2547_v2  ;;  %v2555_v14 = vpop.f32.mrf.mxu2 }
 0x152   :  { %2845 = vst [vmem:[#allocation17_spill] sm:$0xff] %v2555_v14  ;;  %v329_v14 = vadd.f32 %v328_v47, %v2416_v30 }
 0x154   :  { %823 = vmatpush.bf16.msrb.mxu1 %v2460_v26  ;;  %v2564_v25 = vpop.f32.mrf.mxu3 }
 0x155   :  { %911 = vmatpush.bf16.msrb.mxu2 %v2381_v4  ;;  %924 = vmatpush.bf16.msrb.mxu3 %v2421_v38  ;;  %2849 = vst [vmem:[#allocation21_spill] sm:$0xff] %v2564_v25 }
 0x158   :  { %824 = vmatpush.bf16.msrb.mxu1 %v2469_v42  ;;  %v2553_v11 = vpop.f32.mrf.mxu1 }
 0x159   :  { %912 = vmatpush.bf16.msrb.mxu2 %v2388_v12  ;;  %925 = vmatpush.bf16.msrb.mxu3 %v2430_v51  ;;  %2844 = vst [vmem:[#allocation16_spill] sm:$0xff] %v2553_v11  ;;  %v2561_v20 = vpop.f32.mrf.mxu2 }
 0x15a   :  { %2848 = vst [vmem:[#allocation20_spill] sm:$0xff] %v2561_v20 }
 0x15c   :  { %825 = vmatpush.bf16.msrb.mxu1 %v2476_v54 }
 0x15d   :  { %913 = vmatpush.bf16.msrb.mxu2 %v2402_v22  ;;  %926 = vmatpush.bf16.msrb.mxu3 %v2440_v6 }
 0x160   :  { %945 = vmatpush.bf16.msra.mxu1 %v2413_v29  ;;  %v2559_v18 = vpop.f32.mrf.mxu1 }
 0x161   :  { %2847 = vst [vmem:[#allocation19_spill] sm:$0xff] %v2559_v18 }
 0x164   :  { %946 = vmatpush.bf16.msra.mxu1 %v2427_v49 }
 0x168   :  { %947 = vmatpush.bf16.msra.mxu1 %v2436_v61 }
 0x16c   :  { %948 = vmatpush.bf16.msra.mxu1 %v2446_v10 }
 0x170   :  { %949 = vmatpush.bf16.msra.mxu1 %v2455_v21 }
 0x174   :  { %950 = vmatpush.bf16.msra.mxu1 %v2460_v26 }
 0x178   :  { %951 = vmatpush.bf16.msra.mxu1 %v2469_v42 }
 0x17c   :  { %952 = vmatpush.bf16.msra.mxu1 %v2476_v54 }
 0x1bc   :  { %v661_v33 = vpop.f32.mrf.mxu1 }
 0x1bd   :  { %v704_v37 = vadd.f32 %v661_v33, %v271_v24 }
 0x1bf   :  { %v1873_v39 = vmul.f32 -1.442695, %v704_v37 }
 0x1c1   :  { %2000 = vpow2.f32 %v1873_v39 }
 0x1c2   :  { %v674_v11 = vpop.f32.mrf.mxu2 }
 0x1c3   :  { %v705_v19 = vadd.f32 %v674_v11, %v300_v41  ;;  %v687_v18 = vpop.f32.mrf.mxu3  ;;  %v357_v11 = vpop.f32.mrf.mxu0 }
 0x1c4   :  { %v706_v3 = vadd.f32 %v687_v18, %v329_v14  ;;  %v663_v20 = vpop.f32.mrf.mxu1 }
 0x1c5   :  { %v1874_v2 = vmul.f32 -1.442695, %v705_v19 }
 0x1c6   :  { %v1875_v43 = vmul.f32 -1.442695, %v706_v3  ;;  %v358_v3 = vadd.f32 %v357_v11, %v2463_v32 }
 0x1c7   :  { %v2001_v7 = vpop.eup %2000  ;;  %2002 = vpow2.f32 %v1874_v2 }
 0x1c8   :  { %v717_v25 = vadd.f32 1.0, %v2001_v7  ;;  %2004 = vpow2.f32 %v1875_v43 }
 0x1ca   :  { %2006 = vrcp.f32 %v717_v25  ;;  %v676_v16 = vpop.f32.mrf.mxu2  ;;  %v731_v62 = vand.u32 2147483648, %v717_v25  ;;  %vm725_vm3 = vweird.f32 %v717_v25 }
 0x1cb   :  { %v689_v24 = vpop.f32.mrf.mxu3 }
 0x1cc   :  { %v700_v33 = vpop.f32.mrf.mxu1 }
 0x1cd   :  { %v2003_v37 = vpop.eup %2002  ;;  %v707_v18 = vadd.f32 %v700_v33, %v358_v3 }
 0x1ce   :  { %v2005_v46 = vpop.eup %2004  ;;  %v718_v39 = vadd.f32 1.0, %v2003_v37 }
 0x1cf   :  { %v719_v0 = vadd.f32 1.0, %v2005_v46  ;;  %v729_v46 = vand.u32 2147483647, %v717_v25 }
 0x1d0   :  { %v2007_v47 = vpop.eup %2006  ;;  %2008 = vrcp.f32 %v718_v39  ;;  %v746_v1 = vand.u32 2147483648, %v718_v39  ;;  %v744_v11 = vand.u32 2147483647, %v718_v39  ;;  %vm740_vm6 = vweird.f32 %v718_v39 }
 0x1d1   :  { %v721_v41 = vmul.f32 %v2007_v47, %v717_v25  ;;  %2010 = vrcp.f32 %v719_v0  ;;  %vm726_vm2 = vweird.f32 %v2007_v47  ;;  %vm730_vm7 = vcmp.eq.f32.partialorder %v729_v46, 8.507059e+37 }
 0x1d2   :  { %vm727_vm4 = vmor %vm725_vm3, %vm726_vm2  ;;  %2012 = vtanh.f32 %v707_v18  ;;  %v747_v3 = vor.u32 1.1754944e-38, %v746_v1  ;;  %vm745_vm9 = vcmp.eq.f32.partialorder %v744_v11, 8.507059e+37  ;;  %vm755_vm11 = vweird.f32 %v719_v0 }
 0x1d3   :  { %v722_v14 = vsub.f32 1.0, %v721_v41 }
 0x1d4   :  { %v702_v19 = vpop.f32.mrf.mxu1 }
 0x1d5   :  { %v723_v2 = vmul.f32 %v2007_v47, %v722_v14  ;;  %v732_v14 = vor.u32 1.1754944e-38, %v731_v62  ;;  %v761_v62 = vand.u32 2147483648, %v719_v0 }
 0x1d6   :  { %v2009_v7 = vpop.eup %2008 }
 0x1d7   :  { %v2011_v20 = vpop.eup %2010  ;;  %v736_v43 = vmul.f32 %v2009_v7, %v718_v39  ;;  %v724_v16 = vadd.f32 %v2007_v47, %v723_v2  ;;  %vm741_vm5 = vweird.f32 %v2009_v7  ;;  %v762_v39 = vor.u32 1.1754944e-38, %v761_v62 }
 0x1d8   :  { %v751_v24 = vmul.f32 %v2011_v20, %v719_v0  ;;  %vm742_vm8 = vmor %vm740_vm6, %vm741_vm5  ;;  %vm756_vm10 = vweird.f32 %v2011_v20 }
 0x1d9   :  { %v737_v37 = vsub.f32 1.0, %v736_v43  ;;  %v728_v41 = vsel %vm727_vm4, %v2007_v47, %v724_v16  ;;  %v2013_v43 = vpop.eup %2012  ;;  %vm757_vm12 = vmor %vm755_vm11, %vm756_vm10 }
 0x1da   :  { %v752_v19 = vsub.f32 1.0, %v751_v24  ;;  %v733_v2 = vsel %vm730_vm7, %v732_v14, %v728_v41  ;;  %v332_v41 = vadd.f32 %v2533_v53, %v2416_v30 }
 0x1db   :  { %v738_v58 = vmul.f32 %v2009_v7, %v737_v37  ;;  %v767_v18 = vmul.f32 %v2013_v43, %v733_v2  ;;  %v303_v2 = vadd.f32 %v2531_v52, %v2567_v34 }
 0x1dc   :  { %v753_v25 = vmul.f32 %v2011_v20, %v752_v19 }
 0x1dd   :  { %v739_v33 = vadd.f32 %v2009_v7, %v738_v58  ;;  %v759_v58 = vand.u32 2147483647, %v719_v0 }
 0x1de   :  { %v754_v47 = vadd.f32 %v2011_v20, %v753_v25 }
 0x1df   :  { %v743_v55 = vsel %vm742_vm8, %v2009_v7, %v739_v33  ;;  %vm760_vm13 = vcmp.eq.f32.partialorder %v759_v58, 8.507059e+37 }
 0x1e0   :  { %v748_v59 = vsel %vm745_vm9, %v747_v3, %v743_v55  ;;  %v758_v1 = vsel %vm757_vm12, %v2011_v20, %v754_v47  ;;  %v274_v3 = vadd.f32 %v2529_v50, %v2408_v27 }
 0x1e1   :  { %v766_v32 = vmul.f32 %v748_v59, %v2485_v17  ;;  %v763_v16 = vsel %vm760_vm13, %v762_v39, %v758_v1 }
 0x1e3   :  { %v2573_v37 = vadd.f32 %v767_v18, %v766_v32  ;;  %v360_v32 = vpop.f32.mrf.mxu0 }
 0x1e5   :  { %2014 = vtanh.f32 %v2573_v37 }
 0x1eb   :  { %v2015_v7 = vpop.eup %2014  ;;  %v2608_v17 = vpop.f32.mrf.mxu0 }
 0x1ec   :  { %v770_v55 = vmul.f32 %v2015_v7, %v763_v16 }
 0x1ee   :  { %v778_v24 = vpack.c.bf16 %v770_v55, %v770_v55 }
 0x1f0   :  { %787 = vmatmul.bf16.vlgmr.msra.gmra.mxu2 %v778_v24  ;;  %800 = vmatmul.bf16.vlgmr.msra.gmra.mxu3 %v778_v24 }
 0x1f1   :  { %813 = vmatmul.bf16.vlgmr.msra.gmra.mxu0 %v778_v24  ;;  %826 = vmatmul.bf16.vlgmr.msrb.gmra.mxu1 %v778_v24 }
 0x1f2   :  { %1033 = vmatpush.bf16.msra.mxu2 %v2346_v31  ;;  %1046 = vmatpush.bf16.msra.mxu3 %v2327_v9 }
 0x1f3   :  { %1059 = vmatpush.bf16.msra.mxu0 %v2350_v36  ;;  %1072 = vmatpush.bf16.msrb.mxu1 %v2413_v29  ;;  %v2610_v59 = vpop.f32.mrf.mxu0 }
 0x1f4   :  { %2850 = vst [vmem:[#allocation22_spill] sm:$0xff] %v2610_v59 }
 0x1f6   :  { %1034 = vmatpush.bf16.msra.mxu2 %v2356_v40  ;;  %1047 = vmatpush.bf16.msra.mxu3 %v2348_v35 }
 0x1f7   :  { %1060 = vmatpush.bf16.msra.mxu0 %v2360_v45  ;;  %1073 = vmatpush.bf16.msrb.mxu1 %v2427_v49 }
 0x1fa   :  { %1035 = vmatpush.bf16.msra.mxu2 %v2372_v57  ;;  %1048 = vmatpush.bf16.msra.mxu3 %v2358_v44 }
 0x1fb   :  { %1061 = vmatpush.bf16.msra.mxu0 %v2383_v5  ;;  %1074 = vmatpush.bf16.msrb.mxu1 %v2436_v61  ;;  %v2612_v0 = vpop.f32.mrf.mxu0 }
 0x1fc   :  { %2851 = vst [vmem:[#allocation23_spill] sm:$0xff] %v2612_v0 }
 0x1fe   :  { %1036 = vmatpush.bf16.msra.mxu2 %v2375_v60  ;;  %1049 = vmatpush.bf16.msra.mxu3 %v2390_v13 }
 0x1ff   :  { %1062 = vmatpush.bf16.msra.mxu0 %v2392_v15  ;;  %1075 = vmatpush.bf16.msrb.mxu1 %v2446_v10 }
 0x202   :  { %1037 = vmatpush.bf16.msra.mxu2 %v2378_v63  ;;  %1050 = vmatpush.bf16.msra.mxu3 %v2405_v23 }
 0x203   :  { %1063 = vmatpush.bf16.msra.mxu0 %v2410_v28  ;;  %1076 = vmatpush.bf16.msrb.mxu1 %v2455_v21  ;;  %v2614_v20 = vpop.f32.mrf.mxu0 }
 0x204   :  { %2852 = vst [vmem:[#allocation24_spill] sm:$0xff] %v2614_v20 }
 0x206   :  { %1038 = vmatpush.bf16.msra.mxu2 %v2381_v4  ;;  %1051 = vmatpush.bf16.msra.mxu3 %v2421_v38 }
 0x207   :  { %1064 = vmatpush.bf16.msra.mxu0 %v2425_v48  ;;  %1077 = vmatpush.bf16.msrb.mxu1 %v2460_v26 }
 0x20a   :  { %1039 = vmatpush.bf16.msra.mxu2 %v2388_v12  ;;  %1052 = vmatpush.bf16.msra.mxu3 %v2430_v51 }
 0x20b   :  { %1065 = vmatpush.bf16.msra.mxu0 %v2434_v56  ;;  %1078 = vmatpush.bf16.msrb.mxu1 %v2469_v42  ;;  %v2616_v46 = vpop.f32.mrf.mxu0 }
 0x20c   :  { %2853 = vst [vmem:[#allocation25_spill] sm:$0xff] %v2616_v46 }
 0x20e   :  { %1040 = vmatpush.bf16.msra.mxu2 %v2402_v22  ;;  %1053 = vmatpush.bf16.msra.mxu3 %v2440_v6 }
 0x20f   :  { %1066 = vmatpush.bf16.msra.mxu0 %v2444_v8  ;;  %1079 = vmatpush.bf16.msrb.mxu1 %v2476_v54 }
 0x26e   :  { %v814_v11 = vpop.f32.mrf.mxu0  ;;  %v827_v19 = vpop.f32.mrf.mxu1 }
 0x26f   :  { %v833_v14 = vadd.f32 %v814_v11, %v332_v41  ;;  %v2854_v11 = vld [vmem:[#allocation6_spill] sm:$0xff] }
 0x271   :  { %v1878_v33 = vmul.f32 -1.442695, %v833_v14  ;;  %v361_v14 = vadd.f32 %v360_v32, %v2854_v11 }
 0x273   :  { %2016 = vpow2.f32 %v1878_v33  ;;  %v788_v43 = vpop.f32.mrf.mxu2  ;;  %v801_v25 = vpop.f32.mrf.mxu3 }
 0x274   :  { %v831_v18 = vadd.f32 %v788_v43, %v274_v3  ;;  %v832_v47 = vadd.f32 %v801_v25, %v303_v2  ;;  %v834_v2 = vadd.f32 %v827_v19, %v361_v14 }
 0x276   :  { %v1876_v62 = vmul.f32 -1.442695, %v831_v18  ;;  %v1877_v58 = vmul.f32 -1.442695, %v832_v47  ;;  %v816_v1 = vpop.f32.mrf.mxu0  ;;  %v829_v39 = vpop.f32.mrf.mxu1 }
 0x278   :  { %2018 = vpow2.f32 %v1876_v62 }
 0x279   :  { %v2017_v53 = vpop.eup %2016  ;;  %2020 = vpow2.f32 %v1877_v58 }
 0x27a   :  { %v846_v55 = vadd.f32 1.0, %v2017_v53 }
 0x27b   :  { %v790_v7 = vpop.f32.mrf.mxu2  ;;  %v803_v16 = vpop.f32.mrf.mxu3 }
 0x27c   :  { %2022 = vrcp.f32 %v846_v55  ;;  %vm882_vm7 = vweird.f32 %v846_v55 }
 0x27e   :  { %v2019_v24 = vpop.eup %2018 }
 0x27f   :  { %v2021_v50 = vpop.eup %2020  ;;  %v844_v41 = vadd.f32 1.0, %v2019_v24 }
 0x280   :  { %v845_v52 = vadd.f32 1.0, %v2021_v50 }
 0x281   :  { %2024 = vrcp.f32 %v844_v41  ;;  %v858_v58 = vand.u32 2147483648, %v844_v41  ;;  %v856_v53 = vand.u32 2147483647, %v844_v41  ;;  %vm852_vm0 = vweird.f32 %v844_v41 }
 0x282   :  { %2026 = vrcp.f32 %v845_v52  ;;  %v2023_v33 = vpop.eup %2022  ;;  %v873_v7 = vand.u32 2147483648, %v845_v52  ;;  %v871_v24 = vand.u32 2147483647, %v845_v52  ;;  %vm867_vm2 = vweird.f32 %v845_v52 }
 0x283   :  { %v878_v47 = vmul.f32 %v2023_v33, %v846_v55  ;;  %2028 = vtanh.f32 %v834_v2  ;;  %v859_v19 = vor.u32 1.1754944e-38, %v858_v58  ;;  %vm857_vm3 = vcmp.eq.f32.partialorder %v856_v53, 8.507059e+37 }
 0x284   :  { %v874_v2 = vor.u32 1.1754944e-38, %v873_v7  ;;  %vm872_vm5 = vcmp.eq.f32.partialorder %v871_v24, 8.507059e+37  ;;  %vm883_vm6 = vweird.f32 %v2023_v33  ;;  %v888_v58 = vand.u32 2147483648, %v846_v55 }
 0x285   :  { %v879_v50 = vsub.f32 1.0, %v878_v47  ;;  %vm884_vm8 = vmor %vm882_vm7, %vm883_vm6 }
 0x287   :  { %v2025_v3 = vpop.eup %2024  ;;  %v880_v0 = vmul.f32 %v2023_v33, %v879_v50  ;;  %v2857_v50 = vld [vmem:[#allocation8_spill] sm:$0xff] }
 0x288   :  { %v2027_v43 = vpop.eup %2026  ;;  %v848_v25 = vmul.f32 %v2025_v3, %v844_v41  ;;  %vm853_vm14 = vweird.f32 %v2025_v3 }
 0x289   :  { %v863_v18 = vmul.f32 %v2027_v43, %v845_v52  ;;  %vm868_vm15 = vweird.f32 %v2027_v43  ;;  %vm854_vm1 = vmor %vm852_vm0, %vm853_vm14  ;;  %v881_v41 = vadd.f32 %v2023_v33, %v880_v0  ;;  %v886_v52 = vand.u32 2147483647, %v846_v55 }
 0x28a   :  { %v849_v62 = vsub.f32 1.0, %v848_v25  ;;  %vm869_vm4 = vmor %vm867_vm2, %vm868_vm15  ;;  %v2029_v25 = vpop.eup %2028 }
 0x28b   :  { %v864_v1 = vsub.f32 1.0, %v863_v18  ;;  %vm887_vm9 = vcmp.eq.f32.partialorder %v886_v52, 8.507059e+37 }
 0x28c   :  { %v850_v39 = vmul.f32 %v2025_v3, %v849_v62 }
 0x28d   :  { %v865_v16 = vmul.f32 %v2027_v43, %v864_v1 }
 0x28e   :  { %v851_v32 = vadd.f32 %v2025_v3, %v850_v39  ;;  %v889_v39 = vor.u32 1.1754944e-38, %v888_v58 }
 0x28f   :  { %v866_v14 = vadd.f32 %v2027_v43, %v865_v16  ;;  %v2856_v16 = vld [vmem:[#allocation7_spill] sm:$0xff] }
 0x290   :  { %v855_v46 = vsel %vm854_vm1, %v2025_v3, %v851_v32  ;;  %v885_v3 = vsel %vm884_vm8, %v2023_v33, %v881_v41  ;;  %v276_v24 = vadd.f32 %v2856_v16, %v2408_v27  ;;  %v305_v32 = vadd.f32 %v2857_v50, %v2567_v34 }
 0x291   :  { %v860_v18 = vsel %vm857_vm3, %v859_v19, %v855_v46  ;;  %v870_v62 = vsel %vm869_vm4, %v2027_v43, %v866_v14  ;;  %v890_v43 = vsel %vm887_vm9, %v889_v39, %v885_v3 }
 0x292   :  { %v875_v20 = vsel %vm872_vm5, %v874_v2, %v870_v62  ;;  %v894_v1 = vmul.f32 %v2029_v25, %v860_v18 }
 0x293   :  { %v893_v59 = vmul.f32 %v875_v20, %v2573_v37  ;;  %v2855_v37 = vld [vmem:[#allocation9_spill] sm:$0xff] }
 0x295   :  { %v2626_v47 = vadd.f32 %v894_v1, %v893_v59  ;;  %v334_v59 = vadd.f32 %v2855_v37, %v2416_v30  ;;  %v363_v37 = vadd.f32 %v2608_v17, %v2854_v11 }
 0x297   :  { %2030 = vtanh.f32 %v2626_v47 }
 0x29d   :  { %v2031_v46 = vpop.eup %2030 }
 0x29e   :  { %v897_v53 = vmul.f32 %v2031_v46, %v890_v43 }
 0x2a0   :  { %v905_v7 = vpack.c.bf16 %v897_v53, %v897_v53 }
 0x2a2   :  { %914 = vmatmul.bf16.vlgmr.msrb.gmra.mxu2 %v905_v7  ;;  %927 = vmatmul.bf16.vlgmr.msrb.gmra.mxu3 %v905_v7 }
 0x2a3   :  { %940 = vmatmul.bf16.vlgmr.msrb.gmra.mxu0 %v905_v7  ;;  %953 = vmatmul.bf16.vlgmr.msra.gmra.mxu1 %v905_v7 }
 0x2a4   :  { %1160 = vmatpush.bf16.msrb.mxu2 %v2346_v31  ;;  %1173 = vmatpush.bf16.msrb.mxu3 %v2327_v9 }
 0x2a5   :  { %1186 = vmatpush.bf16.msrb.mxu0 %v2350_v36  ;;  %1199 = vmatpush.bf16.msra.mxu1 %v2413_v29 }
 0x2a8   :  { %1161 = vmatpush.bf16.msrb.mxu2 %v2356_v40  ;;  %1174 = vmatpush.bf16.msrb.mxu3 %v2348_v35 }
 0x2a9   :  { %1187 = vmatpush.bf16.msrb.mxu0 %v2360_v45  ;;  %1200 = vmatpush.bf16.msra.mxu1 %v2427_v49 }
 0x2ac   :  { %1162 = vmatpush.bf16.msrb.mxu2 %v2372_v57  ;;  %1175 = vmatpush.bf16.msrb.mxu3 %v2358_v44 }
 0x2ad   :  { %1188 = vmatpush.bf16.msrb.mxu0 %v2383_v5  ;;  %1201 = vmatpush.bf16.msra.mxu1 %v2436_v61 }
 0x2b0   :  { %1163 = vmatpush.bf16.msrb.mxu2 %v2375_v60  ;;  %1176 = vmatpush.bf16.msrb.mxu3 %v2390_v13 }
 0x2b1   :  { %1189 = vmatpush.bf16.msrb.mxu0 %v2392_v15  ;;  %1202 = vmatpush.bf16.msra.mxu1 %v2446_v10 }
 0x2b4   :  { %1164 = vmatpush.bf16.msrb.mxu2 %v2378_v63  ;;  %1177 = vmatpush.bf16.msrb.mxu3 %v2405_v23 }
 0x2b5   :  { %1190 = vmatpush.bf16.msrb.mxu0 %v2410_v28  ;;  %1203 = vmatpush.bf16.msra.mxu1 %v2455_v21 }
 0x2b8   :  { %1165 = vmatpush.bf16.msrb.mxu2 %v2381_v4  ;;  %1178 = vmatpush.bf16.msrb.mxu3 %v2421_v38 }
 0x2b9   :  { %1191 = vmatpush.bf16.msrb.mxu0 %v2425_v48  ;;  %1204 = vmatpush.bf16.msra.mxu1 %v2460_v26 }
 0x2bc   :  { %1166 = vmatpush.bf16.msrb.mxu2 %v2388_v12  ;;  %1179 = vmatpush.bf16.msrb.mxu3 %v2430_v51 }
 0x2bd   :  { %1192 = vmatpush.bf16.msrb.mxu0 %v2434_v56  ;;  %1205 = vmatpush.bf16.msra.mxu1 %v2469_v42 }
 0x2c0   :  { %1167 = vmatpush.bf16.msrb.mxu2 %v2402_v22  ;;  %1180 = vmatpush.bf16.msrb.mxu3 %v2440_v6 }
 0x2c1   :  { %1193 = vmatpush.bf16.msrb.mxu0 %v2444_v8  ;;  %1206 = vmatpush.bf16.msra.mxu1 %v2476_v54 }
 0x320   :  { %v941_v0 = vpop.f32.mrf.mxu0  ;;  %v954_v20 = vpop.f32.mrf.mxu1 }
 0x321   :  { %v960_v55 = vadd.f32 %v941_v0, %v334_v59 }
 0x323   :  { %v1881_v33 = vmul.f32 -1.442695, %v960_v55  ;;  %v961_v55 = vadd.f32 %v954_v20, %v363_v37 }
 0x325   :  { %2032 = vpow2.f32 %v1881_v33  ;;  %v915_v19 = vpop.f32.mrf.mxu2  ;;  %v928_v14 = vpop.f32.mrf.mxu3 }
 0x326   :  { %v958_v2 = vadd.f32 %v915_v19, %v276_v24  ;;  %v959_v25 = vadd.f32 %v928_v14, %v305_v32 }
 0x328   :  { %v1879_v18 = vmul.f32 -1.442695, %v958_v2  ;;  %v1880_v62 = vmul.f32 -1.442695, %v959_v25  ;;  %v943_v1 = vpop.f32.mrf.mxu0  ;;  %v956_v41 = vpop.f32.mrf.mxu1 }
 0x32a   :  { %2034 = vpow2.f32 %v1879_v18 }
 0x32b   :  { %v2033_v58 = vpop.eup %2032  ;;  %2036 = vpow2.f32 %v1880_v62 }
 0x32c   :  { %v973_v39 = vadd.f32 1.0, %v2033_v58 }
 0x32d   :  { %v917_v52 = vpop.f32.mrf.mxu2  ;;  %v930_v3 = vpop.f32.mrf.mxu3 }
 0x32e   :  { %2038 = vrcp.f32 %v973_v39  ;;  %vm1009_vm3 = vweird.f32 %v973_v39 }
 0x330   :  { %v2035_v46 = vpop.eup %2034 }
 0x331   :  { %v2037_v43 = vpop.eup %2036  ;;  %v971_v53 = vadd.f32 1.0, %v2035_v46 }
 0x332   :  { %v972_v7 = vadd.f32 1.0, %v2037_v43 }
 0x333   :  { %2040 = vrcp.f32 %v971_v53  ;;  %v985_v19 = vand.u32 2147483648, %v971_v53  ;;  %v983_v25 = vand.u32 2147483647, %v971_v53  ;;  %vm979_vm12 = vweird.f32 %v971_v53 }
 0x334   :  { %2042 = vrcp.f32 %v972_v7  ;;  %v2039_v59 = vpop.eup %2038  ;;  %v1000_v18 = vand.u32 2147483648, %v972_v7  ;;  %v998_v1 = vand.u32 2147483647, %v972_v7  ;;  %vm994_vm14 = vweird.f32 %v972_v7 }
 0x335   :  { %v1005_v50 = vmul.f32 %v2039_v59, %v973_v39  ;;  %2044 = vtanh.f32 %v961_v55  ;;  %v986_v20 = vor.u32 1.1754944e-38, %v985_v19  ;;  %vm984_vm15 = vcmp.eq.f32.partialorder %v983_v25, 8.507059e+37 }
 0x336   :  { %v1001_v3 = vor.u32 1.1754944e-38, %v1000_v18  ;;  %vm999_vm1 = vcmp.eq.f32.partialorder %v998_v1, 8.507059e+37  ;;  %vm1010_vm2 = vweird.f32 %v2039_v59  ;;  %v1015_v19 = vand.u32 2147483648, %v973_v39 }
 0x337   :  { %v1006_v41 = vsub.f32 1.0, %v1005_v50  ;;  %vm1011_vm4 = vmor %vm1009_vm3, %vm1010_vm2 }
 0x339   :  { %v2041_v0 = vpop.eup %2040 }
 0x33a   :  { %v2043_v33 = vpop.eup %2042  ;;  %v975_v16 = vmul.f32 %v2041_v0, %v971_v53  ;;  %vm980_vm10 = vweird.f32 %v2041_v0 }
 0x33b   :  { %v990_v24 = vmul.f32 %v2043_v33, %v972_v7  ;;  %vm995_vm11 = vweird.f32 %v2043_v33  ;;  %vm981_vm13 = vmor %vm979_vm12, %vm980_vm10  ;;  %v2045_v46 = vpop.eup %2044  ;;  %v1013_v7 = vand.u32 2147483647, %v973_v39 }
 0x33c   :  { %v976_v32 = vsub.f32 1.0, %v975_v16  ;;  %vm996_vm0 = vmor %vm994_vm14, %vm995_vm11  ;;  %v1007_v16 = vmul.f32 %v2039_v59, %v1006_v41 }
 0x33d   :  { %v991_v14 = vsub.f32 1.0, %v990_v24  ;;  %vm1014_vm5 = vcmp.eq.f32.partialorder %v1013_v7, 8.507059e+37 }
 0x33e   :  { %v977_v2 = vmul.f32 %v2041_v0, %v976_v32  ;;  %v1008_v53 = vadd.f32 %v2039_v59, %v1007_v16 }
 0x33f   :  { %v992_v62 = vmul.f32 %v2043_v33, %v991_v14  ;;  %v1016_v14 = vor.u32 1.1754944e-38, %v1015_v19 }
 0x340   :  { %v978_v17 = vadd.f32 %v2041_v0, %v977_v2 }
 0x341   :  { %v993_v58 = vadd.f32 %v2043_v33, %v992_v62 }
 0x342   :  { %v982_v52 = vsel %vm981_vm13, %v2041_v0, %v978_v17  ;;  %v1012_v0 = vsel %vm1011_vm4, %v2039_v59, %v1008_v53  ;;  %v2859_v17 = vld [vmem:[#allocation10_spill] sm:$0xff] }
 0x343   :  { %v987_v43 = vsel %vm984_vm15, %v986_v20, %v982_v52  ;;  %v997_v37 = vsel %vm996_vm0, %v2043_v33, %v993_v58  ;;  %v1017_v2 = vsel %vm1014_vm5, %v1016_v14, %v1012_v0  ;;  %v279_v20 = vadd.f32 %v2859_v17, %v2408_v27  ;;  %v2860_v58 = vld [vmem:[#allocation11_spill] sm:$0xff] }
 0x344   :  { %v1002_v55 = vsel %vm999_vm1, %v1001_v3, %v997_v37  ;;  %v1021_v24 = vmul.f32 %v2045_v46, %v987_v43  ;;  %v308_v52 = vadd.f32 %v2860_v58, %v2567_v34 }
 0x345   :  { %v1020_v32 = vmul.f32 %v1002_v55, %v2626_v47  ;;  %v2858_v47 = vld [vmem:[#allocation12_spill] sm:$0xff] }
 0x346   :  { %v337_v39 = vadd.f32 %v2858_v47, %v2416_v30 }
 0x347   :  { %v2670_v50 = vadd.f32 %v1021_v24, %v1020_v32 }
 0x349   :  { %2046 = vtanh.f32 %v2670_v50 }
 0x34f   :  { %v2047_v33 = vpop.eup %2046 }
 0x350   :  { %v1024_v25 = vmul.f32 %v2047_v33, %v1017_v2 }
 0x352   :  { %v1032_v18 = vpack.c.bf16 %v1024_v25, %v1024_v25 }
 0x354   :  { %1041 = vmatmul.bf16.vlgmr.msra.gmra.mxu2 %v1032_v18  ;;  %1054 = vmatmul.bf16.vlgmr.msra.gmra.mxu3 %v1032_v18 }
 0x355   :  { %1067 = vmatmul.bf16.vlgmr.msra.gmra.mxu0 %v1032_v18  ;;  %1080 = vmatmul.bf16.vlgmr.msrb.gmra.mxu1 %v1032_v18  ;;  %v2861_v18 = vld [vmem:[#allocation22_spill] sm:$0xff] }
 0x356   :  { %1287 = vmatpush.bf16.msra.mxu2 %v2346_v31  ;;  %1300 = vmatpush.bf16.msra.mxu3 %v2327_v9  ;;  %v366_v47 = vadd.f32 %v2861_v18, %v2854_v11 }
 0x357   :  { %1313 = vmatpush.bf16.msra.mxu0 %v2350_v36  ;;  %1326 = vmatpush.bf16.msrb.mxu1 %v2413_v29 }
 0x35a   :  { %1288 = vmatpush.bf16.msra.mxu2 %v2356_v40  ;;  %1301 = vmatpush.bf16.msra.mxu3 %v2348_v35 }
 0x35b   :  { %1314 = vmatpush.bf16.msra.mxu0 %v2360_v45  ;;  %1327 = vmatpush.bf16.msrb.mxu1 %v2427_v49 }
 0x35e   :  { %1289 = vmatpush.bf16.msra.mxu2 %v2372_v57  ;;  %1302 = vmatpush.bf16.msra.mxu3 %v2358_v44 }
 0x35f   :  { %1315 = vmatpush.bf16.msra.mxu0 %v2383_v5  ;;  %1328 = vmatpush.bf16.msrb.mxu1 %v2436_v61 }
 0x362   :  { %1290 = vmatpush.bf16.msra.mxu2 %v2375_v60  ;;  %1303 = vmatpush.bf16.msra.mxu3 %v2390_v13 }
 0x363   :  { %1316 = vmatpush.bf16.msra.mxu0 %v2392_v15  ;;  %1329 = vmatpush.bf16.msrb.mxu1 %v2446_v10 }
 0x366   :  { %1291 = vmatpush.bf16.msra.mxu2 %v2378_v63  ;;  %1304 = vmatpush.bf16.msra.mxu3 %v2405_v23 }
 0x367   :  { %1317 = vmatpush.bf16.msra.mxu0 %v2410_v28  ;;  %1330 = vmatpush.bf16.msrb.mxu1 %v2455_v21 }
 0x36a   :  { %1292 = vmatpush.bf16.msra.mxu2 %v2381_v4  ;;  %1305 = vmatpush.bf16.msra.mxu3 %v2421_v38 }
 0x36b   :  { %1318 = vmatpush.bf16.msra.mxu0 %v2425_v48  ;;  %1331 = vmatpush.bf16.msrb.mxu1 %v2460_v26 }
 0x36e   :  { %1293 = vmatpush.bf16.msra.mxu2 %v2388_v12  ;;  %1306 = vmatpush.bf16.msra.mxu3 %v2430_v51 }
 0x36f   :  { %1319 = vmatpush.bf16.msra.mxu0 %v2434_v56  ;;  %1332 = vmatpush.bf16.msrb.mxu1 %v2469_v42 }
 0x372   :  { %1294 = vmatpush.bf16.msra.mxu2 %v2402_v22  ;;  %1307 = vmatpush.bf16.msra.mxu3 %v2440_v6 }
 0x373   :  { %1320 = vmatpush.bf16.msra.mxu0 %v2444_v8  ;;  %1333 = vmatpush.bf16.msrb.mxu1 %v2476_v54 }
 0x3d2   :  { %v1068_v59 = vpop.f32.mrf.mxu0  ;;  %v1081_v62 = vpop.f32.mrf.mxu1 }
 0x3d3   :  { %v1087_v1 = vadd.f32 %v1068_v59, %v337_v39 }
 0x3d5   :  { %v1884_v41 = vmul.f32 -1.442695, %v1087_v1  ;;  %v1088_v1 = vadd.f32 %v1081_v62, %v366_v47 }
 0x3d7   :  { %2048 = vpow2.f32 %v1884_v41  ;;  %v1042_v3 = vpop.f32.mrf.mxu2  ;;  %v1055_v46 = vpop.f32.mrf.mxu3 }
 0x3d8   :  { %v1085_v43 = vadd.f32 %v1042_v3, %v279_v20  ;;  %v1086_v37 = vadd.f32 %v1055_v46, %v308_v52 }
 0x3da   :  { %v1882_v55 = vmul.f32 -1.442695, %v1085_v43  ;;  %v1883_v16 = vmul.f32 -1.442695, %v1086_v37  ;;  %v1070_v24 = vpop.f32.mrf.mxu0  ;;  %v1083_v32 = vpop.f32.mrf.mxu1 }
 0x3dc   :  { %2050 = vpow2.f32 %v1882_v55 }
 0x3dd   :  { %v2049_v53 = vpop.eup %2048  ;;  %2052 = vpow2.f32 %v1883_v16 }
 0x3de   :  { %v1100_v0 = vadd.f32 1.0, %v2049_v53 }
 0x3df   :  { %v1044_v19 = vpop.f32.mrf.mxu2  ;;  %v1057_v7 = vpop.f32.mrf.mxu3 }
 0x3e0   :  { %2054 = vrcp.f32 %v1100_v0  ;;  %vm1136_vm15 = vweird.f32 %v1100_v0 }
 0x3e2   :  { %v2051_v14 = vpop.eup %2050 }
 0x3e3   :  { %v2053_v33 = vpop.eup %2052  ;;  %v1098_v2 = vadd.f32 1.0, %v2051_v14 }
 0x3e4   :  { %v1099_v25 = vadd.f32 1.0, %v2053_v33 }
 0x3e5   :  { %2056 = vrcp.f32 %v1098_v2  ;;  %v1112_v3 = vand.u32 2147483648, %v1098_v2  ;;  %v1110_v37 = vand.u32 2147483647, %v1098_v2  ;;  %vm1106_vm8 = vweird.f32 %v1098_v2 }
 0x3e6   :  { %2058 = vrcp.f32 %v1099_v25  ;;  %v2055_v39 = vpop.eup %2054  ;;  %v1127_v55 = vand.u32 2147483648, %v1099_v25  ;;  %v1125_v24 = vand.u32 2147483647, %v1099_v25  ;;  %vm1121_vm10 = vweird.f32 %v1099_v25 }
 0x3e7   :  { %v1132_v58 = vmul.f32 %v2055_v39, %v1100_v0  ;;  %2060 = vtanh.f32 %v1088_v1  ;;  %v1113_v62 = vor.u32 1.1754944e-38, %v1112_v3  ;;  %vm1111_vm11 = vcmp.eq.f32.partialorder %v1110_v37, 8.507059e+37 }
 0x3e8   :  { %v1128_v14 = vor.u32 1.1754944e-38, %v1127_v55  ;;  %vm1126_vm13 = vcmp.eq.f32.partialorder %v1125_v24, 8.507059e+37  ;;  %vm1137_vm14 = vweird.f32 %v2055_v39  ;;  %v1142_v3 = vand.u32 2147483648, %v1100_v0 }
 0x3e9   :  { %v1133_v32 = vsub.f32 1.0, %v1132_v58  ;;  %vm1138_vm0 = vmor %vm1136_vm15, %vm1137_vm14 }
 0x3eb   :  { %v2057_v59 = vpop.eup %2056 }
 0x3ec   :  { %v2059_v41 = vpop.eup %2058  ;;  %v1102_v17 = vmul.f32 %v2057_v59, %v1098_v2  ;;  %vm1107_vm6 = vweird.f32 %v2057_v59 }
 0x3ed   :  { %v1117_v20 = vmul.f32 %v2059_v41, %v1099_v25  ;;  %vm1122_vm7 = vweird.f32 %v2059_v41  ;;  %vm1108_vm9 = vmor %vm1106_vm8, %vm1107_vm6  ;;  %v2061_v33 = vpop.eup %2060  ;;  %v1140_v25 = vand.u32 2147483647, %v1100_v0 }
 0x3ee   :  { %v1103_v52 = vsub.f32 1.0, %v1102_v17  ;;  %vm1123_vm12 = vmor %vm1121_vm10, %vm1122_vm7  ;;  %v1134_v17 = vmul.f32 %v2055_v39, %v1133_v32 }
 0x3ef   :  { %v1118_v46 = vsub.f32 1.0, %v1117_v20  ;;  %vm1141_vm1 = vcmp.eq.f32.partialorder %v1140_v25, 8.507059e+37 }
 0x3f0   :  { %v1104_v43 = vmul.f32 %v2057_v59, %v1103_v52  ;;  %v1135_v2 = vadd.f32 %v2055_v39, %v1134_v17 }
 0x3f1   :  { %v1119_v16 = vmul.f32 %v2059_v41, %v1118_v46  ;;  %v1143_v46 = vor.u32 1.1754944e-38, %v1142_v3 }
 0x3f2   :  { %v1105_v53 = vadd.f32 %v2057_v59, %v1104_v43 }
 0x3f3   :  { %v1120_v19 = vadd.f32 %v2059_v41, %v1119_v16 }
 0x3f4   :  { %v1109_v7 = vsel %vm1108_vm9, %v2057_v59, %v1105_v53  ;;  %v1139_v59 = vsel %vm1138_vm0, %v2055_v39, %v1135_v2 }
 0x3f5   :  { %v1114_v18 = vsel %vm1111_vm11, %v1113_v62, %v1109_v7  ;;  %v1124_v47 = vsel %vm1123_vm12, %v2059_v41, %v1120_v19  ;;  %v1144_v43 = vsel %vm1141_vm1, %v1143_v46, %v1139_v59 }
 0x3f6   :  { %v1129_v1 = vsel %vm1126_vm13, %v1128_v14, %v1124_v47  ;;  %v1148_v20 = vmul.f32 %v2061_v33, %v1114_v18 }
 0x3f7   :  { %v1147_v52 = vmul.f32 %v1129_v1, %v2670_v50 }
 0x3f9   :  { %v2714_v58 = vadd.f32 %v1148_v20, %v1147_v52 }
 0x3fb   :  { %2062 = vtanh.f32 %v2714_v58 }
 0x401   :  { %v2063_v41 = vpop.eup %2062 }
 0x402   :  { %v1151_v37 = vmul.f32 %v2063_v41, %v1144_v43 }
 0x404   :  { %v1159_v55 = vpack.c.bf16 %v1151_v37, %v1151_v37 }
 0x406   :  { %1168 = vmatmul.bf16.vlgmr.msrb.gmra.mxu2 %v1159_v55  ;;  %1181 = vmatmul.bf16.vlgmr.msrb.gmra.mxu3 %v1159_v55 }
 0x407   :  { %1194 = vmatmul.bf16.vlgmr.msrb.gmra.mxu0 %v1159_v55  ;;  %1207 = vmatmul.bf16.vlgmr.msra.gmra.mxu1 %v1159_v55 }
 0x408   :  { %1414 = vmatpush.bf16.msrb.mxu2 %v2346_v31  ;;  %1427 = vmatpush.bf16.msrb.mxu3 %v2327_v9  ;;  %v2862_v9 = vld [vmem:[#allocation15_spill] sm:$0xff] }
 0x409   :  { %1440 = vmatpush.bf16.msrb.mxu0 %v2350_v36  ;;  %1453 = vmatpush.bf16.msra.mxu1 %v2413_v29  ;;  %v339_v31 = vadd.f32 %v2862_v9, %v2416_v30 }
 0x40c   :  { %1415 = vmatpush.bf16.msrb.mxu2 %v2356_v40  ;;  %1428 = vmatpush.bf16.msrb.mxu3 %v2348_v35 }
 0x40d   :  { %1441 = vmatpush.bf16.msrb.mxu0 %v2360_v45  ;;  %1454 = vmatpush.bf16.msra.mxu1 %v2427_v49  ;;  %v2863_v45 = vld [vmem:[#allocation13_spill] sm:$0xff] }
 0x410   :  { %1416 = vmatpush.bf16.msrb.mxu2 %v2372_v57  ;;  %1429 = vmatpush.bf16.msrb.mxu3 %v2358_v44  ;;  %v281_v57 = vadd.f32 %v2863_v45, %v2408_v27 }
 0x411   :  { %1442 = vmatpush.bf16.msrb.mxu0 %v2383_v5  ;;  %1455 = vmatpush.bf16.msra.mxu1 %v2436_v61 }
 0x414   :  { %1417 = vmatpush.bf16.msrb.mxu2 %v2375_v60  ;;  %1430 = vmatpush.bf16.msrb.mxu3 %v2390_v13  ;;  %v2864_v60 = vld [vmem:[#allocation14_spill] sm:$0xff] }
 0x415   :  { %1443 = vmatpush.bf16.msrb.mxu0 %v2392_v15  ;;  %1456 = vmatpush.bf16.msra.mxu1 %v2446_v10 }
 0x418   :  { %1418 = vmatpush.bf16.msrb.mxu2 %v2378_v63  ;;  %1431 = vmatpush.bf16.msrb.mxu3 %v2405_v23  ;;  %v310_v63 = vadd.f32 %v2864_v60, %v2567_v34 }
 0x419   :  { %1444 = vmatpush.bf16.msrb.mxu0 %v2410_v28  ;;  %1457 = vmatpush.bf16.msra.mxu1 %v2455_v21 }
 0x41c   :  { %1419 = vmatpush.bf16.msrb.mxu2 %v2381_v4  ;;  %1432 = vmatpush.bf16.msrb.mxu3 %v2421_v38 }
 0x41d   :  { %1445 = vmatpush.bf16.msrb.mxu0 %v2425_v48  ;;  %1458 = vmatpush.bf16.msra.mxu1 %v2460_v26 }
 0x420   :  { %1420 = vmatpush.bf16.msrb.mxu2 %v2388_v12  ;;  %1433 = vmatpush.bf16.msrb.mxu3 %v2430_v51 }
 0x421   :  { %1446 = vmatpush.bf16.msrb.mxu0 %v2434_v56  ;;  %1459 = vmatpush.bf16.msra.mxu1 %v2469_v42 }
 0x424   :  { %1421 = vmatpush.bf16.msrb.mxu2 %v2402_v22  ;;  %1434 = vmatpush.bf16.msrb.mxu3 %v2440_v6 }
 0x425   :  { %1447 = vmatpush.bf16.msrb.mxu0 %v2444_v8  ;;  %1460 = vmatpush.bf16.msra.mxu1 %v2476_v54  ;;  %v2865_v8 = vld [vmem:[#allocation23_spill] sm:$0xff] }
 0x426   :  { %v368_v10 = vadd.f32 %v2865_v8, %v2854_v11 }
 0x484   :  { %v1195_v35 = vpop.f32.mrf.mxu0  ;;  %v1208_v36 = vpop.f32.mrf.mxu1 }
 0x485   :  { %v1214_v40 = vadd.f32 %v1195_v35, %v339_v31  ;;  %v1215_v42 = vadd.f32 %v1208_v36, %v368_v10 }
 0x487   :  { %v1887_v44 = vmul.f32 -1.442695, %v1214_v40 }
 0x489   :  { %2064 = vpow2.f32 %v1887_v44  ;;  %v1169_v4 = vpop.f32.mrf.mxu2  ;;  %v1182_v5 = vpop.f32.mrf.mxu3 }
 0x48a   :  { %v1212_v12 = vadd.f32 %v1169_v4, %v281_v57  ;;  %v1213_v13 = vadd.f32 %v1182_v5, %v310_v63 }
 0x48c   :  { %v1885_v15 = vmul.f32 -1.442695, %v1212_v12  ;;  %v1886_v22 = vmul.f32 -1.442695, %v1213_v13  ;;  %v1197_v23 = vpop.f32.mrf.mxu0  ;;  %v1210_v28 = vpop.f32.mrf.mxu1  ;;  %v2867_v12 = vld [vmem:[#allocation16_spill] sm:$0xff] }
 0x48d   :  { %v284_v13 = vadd.f32 %v2867_v12, %v2408_v27 }
 0x48e   :  { %2066 = vpow2.f32 %v1885_v15  ;;  %v2868_v15 = vld [vmem:[#allocation17_spill] sm:$0xff] }
 0x48f   :  { %v2065_v29 = vpop.eup %2064  ;;  %2068 = vpow2.f32 %v1886_v22  ;;  %v313_v22 = vadd.f32 %v2868_v15, %v2567_v34  ;;  %v1980_v15 = vld [vmem:[%s2829_s6 + $0x28] sm:$0xff] }
 0x490   :  { %v1227_v49 = vadd.f32 1.0, %v2065_v29 }
 0x491   :  { %v1171_v38 = vpop.f32.mrf.mxu2  ;;  %v1184_v48 = vpop.f32.mrf.mxu3 }
 0x492   :  { %2070 = vrcp.f32 %v1227_v49  ;;  %v1269_v55 = vand.u32 2147483648, %v1227_v49  ;;  %vm1263_vm11 = vweird.f32 %v1227_v49  ;;  %v1267_v9 = vand.u32 2147483647, %v1227_v49 }
 0x494   :  { %v2067_v51 = vpop.eup %2066  ;;  %v1270_v35 = vor.u32 1.1754944e-38, %v1269_v55  ;;  %vm1268_vm13 = vcmp.eq.f32.partialorder %v1267_v9, 8.507059e+37 }
 0x495   :  { %v2069_v56 = vpop.eup %2068  ;;  %v1225_v61 = vadd.f32 1.0, %v2067_v51 }
 0x496   :  { %v1226_v6 = vadd.f32 1.0, %v2069_v56 }
 0x497   :  { %2072 = vrcp.f32 %v1225_v61  ;;  %v1239_v24 = vand.u32 2147483648, %v1225_v61  ;;  %v1237_v62 = vand.u32 2147483647, %v1225_v61  ;;  %vm1233_vm4 = vweird.f32 %v1225_v61 }
 0x498   :  { %2074 = vrcp.f32 %v1226_v6  ;;  %v2071_v21 = vpop.eup %2070  ;;  %v1254_v19 = vand.u32 2147483648, %v1226_v6  ;;  %v1252_v14 = vand.u32 2147483647, %v1226_v6  ;;  %vm1248_vm6 = vweird.f32 %v1226_v6 }
 0x499   :  { %v1259_v39 = vmul.f32 %v2071_v21, %v1227_v49  ;;  %2076 = vtanh.f32 %v1215_v42  ;;  %v1240_v47 = vor.u32 1.1754944e-38, %v1239_v24  ;;  %vm1238_vm7 = vcmp.eq.f32.partialorder %v1237_v62, 8.507059e+37 }
 0x49a   :  { %v1255_v20 = vor.u32 1.1754944e-38, %v1254_v19  ;;  %vm1253_vm9 = vcmp.eq.f32.partialorder %v1252_v14, 8.507059e+37  ;;  %vm1264_vm10 = vweird.f32 %v2071_v21 }
 0x49b   :  { %v1260_v33 = vsub.f32 1.0, %v1259_v39  ;;  %vm1265_vm12 = vmor %vm1263_vm11, %vm1264_vm10 }
 0x49d   :  { %v2073_v26 = vpop.eup %2072  ;;  %v1261_v59 = vmul.f32 %v2071_v21, %v1260_v33 }
 0x49e   :  { %v2075_v54 = vpop.eup %2074  ;;  %v1229_v50 = vmul.f32 %v2073_v26, %v1225_v61  ;;  %vm1234_vm2 = vweird.f32 %v2073_v26 }
 0x49f   :  { %v1244_v0 = vmul.f32 %v2075_v54, %v1226_v6  ;;  %vm1249_vm3 = vweird.f32 %v2075_v54  ;;  %vm1235_vm5 = vmor %vm1233_vm4, %vm1234_vm2  ;;  %v2077_v52 = vpop.eup %2076  ;;  %v1262_v37 = vadd.f32 %v2071_v21, %v1261_v59 }
 0x4a0   :  { %v1230_v16 = vsub.f32 1.0, %v1229_v50  ;;  %vm1250_vm8 = vmor %vm1248_vm6, %vm1249_vm3  ;;  %v2869_v50 = vld [vmem:[#allocation24_spill] sm:$0xff] }
 0x4a1   :  { %v1245_v32 = vsub.f32 1.0, %v1244_v0  ;;  %v1266_v31 = vsel %vm1265_vm12, %v2071_v21, %v1262_v37  ;;  %v371_v0 = vadd.f32 %v2869_v50, %v2854_v11 }
 0x4a2   :  { %v1231_v53 = vmul.f32 %v2073_v26, %v1230_v16  ;;  %v1271_v40 = vsel %vm1268_vm13, %v1270_v35, %v1266_v31 }
 0x4a3   :  { %v1246_v7 = vmul.f32 %v2075_v54, %v1245_v32 }
 0x4a4   :  { %v1232_v18 = vadd.f32 %v2073_v26, %v1231_v53 }
 0x4a5   :  { %v1247_v1 = vadd.f32 %v2075_v54, %v1246_v7 }
 0x4a6   :  { %v1236_v17 = vsel %vm1235_vm5, %v2073_v26, %v1232_v18 }
 0x4a7   :  { %v1241_v2 = vsel %vm1238_vm7, %v1240_v47, %v1236_v17  ;;  %v1251_v3 = vsel %vm1250_vm8, %v2075_v54, %v1247_v1 }
 0x4a8   :  { %v1256_v25 = vsel %vm1253_vm9, %v1255_v20, %v1251_v3  ;;  %v1275_v46 = vmul.f32 %v2077_v52, %v1241_v2 }
 0x4a9   :  { %v1274_v41 = vmul.f32 %v1256_v25, %v2714_v58  ;;  %v2866_v58 = vld [vmem:[#allocation18_spill] sm:$0xff] }
 0x4aa   :  { %v342_v57 = vadd.f32 %v2866_v58, %v2416_v30 }
 0x4ab   :  { %v2758_v43 = vadd.f32 %v1275_v46, %v1274_v41 }
 0x4ad   :  { %2078 = vtanh.f32 %v2758_v43 }
 0x4b3   :  { %v2079_v36 = vpop.eup %2078 }
 0x4b4   :  { %v1278_v44 = vmul.f32 %v2079_v36, %v1271_v40 }
 0x4b6   :  { %v1286_v45 = vpack.c.bf16 %v1278_v44, %v1278_v44 }
 0x4b8   :  { %1295 = vmatmul.bf16.vlgmr.msra.gmra.mxu2 %v1286_v45  ;;  %1308 = vmatmul.bf16.vlgmr.msra.gmra.mxu3 %v1286_v45 }
 0x4b9   :  { %1321 = vmatmul.bf16.vlgmr.msra.gmra.mxu0 %v1286_v45  ;;  %1334 = vmatmul.bf16.vlgmr.msrb.gmra.mxu1 %v1286_v45 }
 0x536   :  { %v1322_v60 = vpop.f32.mrf.mxu0  ;;  %v1335_v63 = vpop.f32.mrf.mxu1 }
 0x537   :  { %v1341_v4 = vadd.f32 %v1322_v60, %v342_v57  ;;  %v1342_v24 = vadd.f32 %v1335_v63, %v371_v0 }
 0x539   :  { %v1890_v5 = vmul.f32 -1.442695, %v1341_v4 }
 0x53b   :  { %2080 = vpow2.f32 %v1890_v5  ;;  %v1296_v23 = vpop.f32.mrf.mxu2  ;;  %v1309_v28 = vpop.f32.mrf.mxu3 }
 0x53c   :  { %v1339_v29 = vadd.f32 %v1296_v23, %v284_v13  ;;  %v1340_v38 = vadd.f32 %v1309_v28, %v313_v22  ;;  %v1981_v13 = vld [vmem:[%s2829_s6 + $0x30] sm:$0xff]  ;;  %v2870_v22 = vld [vmem:[#allocation21_spill] sm:$0xff]  ;;  %v1979_v28 = vld [vmem:[%s2829_s6 + $0x20] sm:$0xff] }
 0x53d   :  { %v344_v23 = vadd.f32 %v2870_v22, %v2416_v30 }
 0x53e   :  { %v1888_v48 = vmul.f32 -1.442695, %v1339_v29  ;;  %v1889_v49 = vmul.f32 -1.442695, %v1340_v38  ;;  %v1324_v51 = vpop.f32.mrf.mxu0  ;;  %v1337_v56 = vpop.f32.mrf.mxu1 }
 0x53f   :  { %v1978_v51 = vld [vmem:[%s2829_s6 + $0x18] sm:$0xff]  ;;  %v2871_v56 = vld [vmem:[#allocation19_spill] sm:$0xff] }
 0x540   :  { %2082 = vpow2.f32 %v1888_v48 }
 0x541   :  { %v2081_v61 = vpop.eup %2080  ;;  %2084 = vpow2.f32 %v1889_v49 }
 0x542   :  { %v1354_v10 = vadd.f32 1.0, %v2081_v61  ;;  %v286_v61 = vadd.f32 %v2871_v56, %v2408_v27  ;;  %v1976_v27 = vld [vmem:[%s2829_s6 + $0x8] sm:$0xff]  ;;  %v1615_v56 = vlaneseq }
 0x543   :  { %v1298_v6 = vpop.f32.mrf.mxu2  ;;  %v1311_v8 = vpop.f32.mrf.mxu3 }
 0x544   :  { %2086 = vrcp.f32 %v1354_v10  ;;  %v1396_v45 = vand.u32 2147483648, %v1354_v10  ;;  %vm1390_vm7 = vweird.f32 %v1354_v10  ;;  %v1394_v58 = vand.u32 2147483647, %v1354_v10  ;;  %v2872_v6 = vld [vmem:[#allocation20_spill] sm:$0xff] }
 0x545   :  { %v315_v8 = vadd.f32 %v2872_v6, %v2567_v34 }
 0x546   :  { %v2083_v21 = vpop.eup %2082  ;;  %v1397_v60 = vor.u32 1.1754944e-38, %v1396_v45  ;;  %vm1395_vm9 = vcmp.eq.f32.partialorder %v1394_v58, 8.507059e+37 }
 0x547   :  { %v2085_v26 = vpop.eup %2084  ;;  %v1352_v42 = vadd.f32 1.0, %v2083_v21  ;;  %v1977_v21 = vld [vmem:[%s2829_s6 + $0x10] sm:$0xff] }
 0x548   :  { %v1353_v54 = vadd.f32 1.0, %v2085_v26 }
 0x549   :  { %2088 = vrcp.f32 %v1352_v42  ;;  %v1366_v14 = vand.u32 2147483648, %v1352_v42  ;;  %v1364_v47 = vand.u32 2147483647, %v1352_v42  ;;  %vm1360_vm0 = vweird.f32 %v1352_v42 }
 0x54a   :  { %2090 = vrcp.f32 %v1353_v54  ;;  %v2087_v39 = vpop.eup %2086  ;;  %v1381_v1 = vand.u32 2147483648, %v1353_v54  ;;  %v1379_v20 = vand.u32 2147483647, %v1353_v54  ;;  %vm1375_vm2 = vweird.f32 %v1353_v54 }
 0x54b   :  { %v1386_v19 = vmul.f32 %v2087_v39, %v1354_v10  ;;  %2092 = vtanh.f32 %v1342_v24  ;;  %v1367_v3 = vor.u32 1.1754944e-38, %v1366_v14  ;;  %vm1365_vm3 = vcmp.eq.f32.partialorder %v1364_v47, 8.507059e+37 }
 0x54c   :  { %v1382_v46 = vor.u32 1.1754944e-38, %v1381_v1  ;;  %vm1380_vm5 = vcmp.eq.f32.partialorder %v1379_v20, 8.507059e+37  ;;  %vm1391_vm6 = vweird.f32 %v2087_v39 }
 0x54d   :  { %v1387_v52 = vsub.f32 1.0, %v1386_v19  ;;  %vm1392_vm8 = vmor %vm1390_vm7, %vm1391_vm6  ;;  %vm1619_vm7 = vcmask 39936  }
 0x54f   :  { %v2089_v16 = vpop.eup %2088  ;;  %v1388_v31 = vmul.f32 %v2087_v39, %v1387_v52 }
 0x550   :  { %v2091_v32 = vpop.eup %2090  ;;  %v1356_v53 = vmul.f32 %v2089_v16, %v1352_v42  ;;  %vm1361_vm14 = vweird.f32 %v2089_v16 }
 0x551   :  { %v1371_v62 = vmul.f32 %v2091_v32, %v1353_v54  ;;  %vm1376_vm15 = vweird.f32 %v2091_v32  ;;  %vm1362_vm1 = vmor %vm1360_vm0, %vm1361_vm14  ;;  %v2093_v41 = vpop.eup %2092  ;;  %v1389_v44 = vadd.f32 %v2087_v39, %v1388_v31 }
 0x552   :  { %v1357_v7 = vsub.f32 1.0, %v1356_v53  ;;  %vm1377_vm4 = vmor %vm1375_vm2, %vm1376_vm15 }
 0x553   :  { %v1372_v33 = vsub.f32 1.0, %v1371_v62  ;;  %v1393_v57 = vsel %vm1392_vm8, %v2087_v39, %v1389_v44 }
 0x554   :  { %v1358_v18 = vmul.f32 %v2089_v16, %v1357_v7  ;;  %v1398_v4 = vsel %vm1395_vm9, %v1397_v60, %v1393_v57 }
 0x555   :  { %v1373_v17 = vmul.f32 %v2091_v32, %v1372_v33  ;;  %v2873_v33 = vld [vmem:[#allocation25_spill] sm:$0xff] }
 0x556   :  { %v1359_v2 = vadd.f32 %v2089_v16, %v1358_v18  ;;  %v373_v18 = vadd.f32 %v2873_v33, %v2854_v11 }
 0x557   :  { %v1374_v25 = vadd.f32 %v2091_v32, %v1373_v17 }
 0x558   :  { %v1363_v59 = vsel %vm1362_vm1, %v2089_v16, %v1359_v2 }
 0x559   :  { %v1368_v37 = vsel %vm1365_vm3, %v1367_v3, %v1363_v59  ;;  %v1378_v55 = vsel %vm1377_vm4, %v2091_v32, %v1374_v25  ;;  %v1975_v32 = vld [vmem:[%s2829_s6] sm:$0xff] }
 0x55a   :  { %v1383_v9 = vsel %vm1380_vm5, %v1382_v46, %v1378_v55  ;;  %v1402_v35 = vmul.f32 %v2093_v41, %v1368_v37 }
 0x55b   :  { %v1401_v36 = vmul.f32 %v1383_v9, %v2758_v43  ;;  %v1982_v43 = vld [vmem:[%s2829_s6 + $0x38] sm:$0xff] }
 0x55c   :  { %1602 = vmatpush.bf16.msra.mxu2 %v1982_v43 }
 0x55d   :  { %v2770_v40 = vadd.f32 %v1402_v35, %v1401_v36 }
 0x55f   :  { %2094 = vtanh.f32 %v2770_v40 }
 0x560   :  { %1603 = vmatpush.bf16.msra.mxu2 %v1981_v13 }
 0x564   :  { %1604 = vmatpush.bf16.msra.mxu2 %v1980_v15 }
 0x565   :  { %v2095_v63 = vpop.eup %2094 }
 0x566   :  { %v1405_v5 = vmul.f32 %v2095_v63, %v1398_v4 }
 0x568   :  { %v1413_v12 = vpack.c.bf16 %v1405_v5, %v1405_v5  ;;  %1605 = vmatpush.bf16.msra.mxu2 %v1979_v28 }
 0x56a   :  { %1422 = vmatmul.bf16.vlgmr.msrb.gmra.mxu2 %v1413_v12  ;;  %1435 = vmatmul.bf16.vlgmr.msrb.gmra.mxu3 %v1413_v12 }
 0x56b   :  { %1448 = vmatmul.bf16.vlgmr.msrb.gmra.mxu0 %v1413_v12  ;;  %1461 = vmatmul.bf16.vlgmr.msra.gmra.mxu1 %v1413_v12 }
 0x56c   :  { %1606 = vmatpush.bf16.msra.mxu2 %v1978_v51 }
 0x570   :  { %1607 = vmatpush.bf16.msra.mxu2 %v1977_v21 }
 0x574   :  { %1608 = vmatpush.bf16.msra.mxu2 %v1976_v27 }
 0x578   :  { %1609 = vmatpush.bf16.msra.mxu2 %v1975_v32 }
 0x5e8   :  { %v1449_v29 = vpop.f32.mrf.mxu0  ;;  %v1462_v38 = vpop.f32.mrf.mxu1 }
 0x5e9   :  { %v1468_v48 = vadd.f32 %v1449_v29, %v344_v23  ;;  %v1469_v17 = vadd.f32 %v1462_v38, %v373_v18 }
 0x5eb   :  { %v1893_v49 = vmul.f32 -1.442695, %v1468_v48 }
 0x5ed   :  { %2096 = vpow2.f32 %v1893_v49  ;;  %v1423_v30 = vpop.f32.mrf.mxu2  ;;  %v1436_v10 = vpop.f32.mrf.mxu3 }
 0x5ee   :  { %v1466_v26 = vadd.f32 %v1423_v30, %v286_v61  ;;  %v1467_v42 = vadd.f32 %v1436_v10, %v315_v8  ;;  %v1616_v61 = vand.u32 127, %v1615_v56 }
 0x5f0   :  { %v1891_v54 = vmul.f32 -1.442695, %v1466_v26  ;;  %v1892_v50 = vmul.f32 -1.442695, %v1467_v42  ;;  %v1451_v0 = vpop.f32.mrf.mxu0  ;;  %v1464_v39 = vpop.f32.mrf.mxu1  ;;  %vm1617_vm6 = vcmp.lt.s32.totalorder %v1616_v61, 3 }
 0x5f2   :  { %2098 = vpow2.f32 %v1891_v54 }
 0x5f3   :  { %v2097_v34 = vpop.eup %2096  ;;  %2100 = vpow2.f32 %v1892_v50 }
 0x5f4   :  { %v1481_v53 = vadd.f32 1.0, %v2097_v34 }
 0x5f5   :  { %v1425_v16 = vpop.f32.mrf.mxu2  ;;  %v1438_v24 = vpop.f32.mrf.mxu3 }
 0x5f6   :  { %2102 = vrcp.f32 %v1481_v53  ;;  %v1523_v22 = vand.u32 2147483648, %v1481_v53  ;;  %vm1517_vm3 = vweird.f32 %v1481_v53  ;;  %v1521_v23 = vand.u32 2147483647, %v1481_v53 }
 0x5f8   :  { %v2099_v62 = vpop.eup %2098  ;;  %v1524_v29 = vor.u32 1.1754944e-38, %v1523_v22  ;;  %vm1522_vm5 = vcmp.eq.f32.partialorder %v1521_v23, 8.507059e+37 }
 0x5f9   :  { %v2101_v19 = vpop.eup %2100  ;;  %v1479_v7 = vadd.f32 1.0, %v2099_v62 }
 0x5fa   :  { %v1480_v14 = vadd.f32 1.0, %v2101_v19 }
 0x5fb   :  { %2104 = vrcp.f32 %v1479_v7  ;;  %v1493_v59 = vand.u32 2147483648, %v1479_v7  ;;  %v1491_v37 = vand.u32 2147483647, %v1479_v7  ;;  %vm1487_vm12 = vweird.f32 %v1479_v7 }
 0x5fc   :  { %2106 = vrcp.f32 %v1480_v14  ;;  %v2103_v47 = vpop.eup %2102  ;;  %v1508_v55 = vand.u32 2147483648, %v1480_v14  ;;  %v1506_v31 = vand.u32 2147483647, %v1480_v14  ;;  %vm1502_vm14 = vweird.f32 %v1480_v14 }
 0x5fd   :  { %v1513_v3 = vmul.f32 %v2103_v47, %v1481_v53  ;;  %2108 = vtanh.f32 %v1469_v17  ;;  %v1494_v36 = vor.u32 1.1754944e-38, %v1493_v59  ;;  %vm1492_vm15 = vcmp.eq.f32.partialorder %v1491_v37, 8.507059e+37 }
 0x5fe   :  { %v1509_v58 = vor.u32 1.1754944e-38, %v1508_v55  ;;  %vm1507_vm1 = vcmp.eq.f32.partialorder %v1506_v31, 8.507059e+37  ;;  %vm1518_vm2 = vweird.f32 %v2103_v47 }
 0x5ff   :  { %v1514_v35 = vsub.f32 1.0, %v1513_v3  ;;  %vm1519_vm4 = vmor %vm1517_vm3, %vm1518_vm2 }
 0x601   :  { %v2105_v1 = vpop.eup %2104  ;;  %v1515_v5 = vmul.f32 %v2103_v47, %v1514_v35 }
 0x602   :  { %v2107_v20 = vpop.eup %2106  ;;  %v1483_v52 = vmul.f32 %v2105_v1, %v1479_v7  ;;  %vm1488_vm10 = vweird.f32 %v2105_v1 }
 0x603   :  { %v1498_v2 = vmul.f32 %v2107_v20, %v1480_v14  ;;  %vm1503_vm11 = vweird.f32 %v2107_v20  ;;  %vm1489_vm13 = vmor %vm1487_vm12, %vm1488_vm10  ;;  %v2109_v57 = vpop.eup %2108  ;;  %v1516_v15 = vadd.f32 %v2103_v47, %v1515_v5 }
 0x604   :  { %v1484_v25 = vsub.f32 1.0, %v1483_v52  ;;  %vm1504_vm0 = vmor %vm1502_vm14, %vm1503_vm11 }
 0x605   :  { %v1499_v46 = vsub.f32 1.0, %v1498_v2  ;;  %v1520_v28 = vsel %vm1519_vm4, %v2103_v47, %v1516_v15 }
 0x606   :  { %v1485_v41 = vmul.f32 %v2105_v1, %v1484_v25  ;;  %v1525_v48 = vsel %vm1522_vm5, %v1524_v29, %v1520_v28 }
 0x607   :  { %v1500_v9 = vmul.f32 %v2107_v20, %v1499_v46 }
 0x608   :  { %v1486_v11 = vadd.f32 %v2105_v1, %v1485_v41 }
 0x609   :  { %v1501_v44 = vadd.f32 %v2107_v20, %v1500_v9 }
 0x60a   :  { %v1490_v45 = vsel %vm1489_vm13, %v2105_v1, %v1486_v11 }
 0x60b   :  { %v1505_v60 = vsel %vm1504_vm0, %v2107_v20, %v1501_v44  ;;  %v1495_v63 = vsel %vm1492_vm15, %v1494_v36, %v1490_v45 }
 0x60c   :  { %v1510_v4 = vsel %vm1507_vm1, %v1509_v58, %v1505_v60  ;;  %v1529_v12 = vmul.f32 %v2109_v57, %v1495_v63 }
 0x60d   :  { %v1528_v43 = vmul.f32 %v1510_v4, %v2770_v40  ;;  %v1987_v40 = vld [vmem:[%s2830_s7] ss:$0 sm:$0xff] }
 0x60f   :  { %v1530_v13 = vadd.f32 %v1529_v12, %v1528_v43 }
 0x611   :  { %2110 = vtanh.f32 %v1530_v13 }
 0x617   :  { %v2111_v38 = vpop.eup %2110 }
 0x618   :  { %v1532_v49 = vmul.f32 %v2111_v38, %v1525_v48 }
 0x61a   :  { %v1533_v51 = vpack.c.bf16 %v1532_v49, %v1532_v49 }
 0x61c   :  { %1610 = vmatmul.bf16.vlgmr.msra.gmra.mxu2 %v1533_v51 }
 0x69f   :  { %v1611_v6 = vpop.f32.mrf.mxu2 }
 0x6a0   :  { %v1612_v8 = vadd.f32 %v1987_v40, %v1611_v6 }
 0x6a2   :  { %v1618_v30 = vsel %vm1617_vm6, %v1612_v8, -inf  ;;  %v1623_v26 = vsel %vm1617_vm6, -inf, %v1612_v8 }
 0x6a3   :  { %v1620_v10 = vsel %vm1619_vm7, %v1618_v30, -inf  ;;  %v1624_v42 = vsel %vm1619_vm7, %v1623_v26, -inf }
 0x6a4   :  { %1621 = vmax.xlane.f32.xlu0 %v1620_v10 }
 0x6a7   :  { %v1613_v21 = vpop.f32.mrf.mxu2 }
 0x6ac   :  { %1625 = vmax.xlane.f32.xlu0 %v1624_v42 }
 0x717   :  { %v1622_v54 = vpop.xlane.xlu0 %1621 }
 0x71f   :  { %v1626_v50 = vpop.xlane.xlu0 %1625 }
 0x720   :  { %v1627_v0 = vsel %vm1617_vm6, %v1622_v54, %v1626_v50 }
 0x721   :  { %v1628_v39 = vsub.f32 %v1612_v8, %v1627_v0 }
 0x723   :  { %v1629_v27 = vmul.f32 1.442695, %v1628_v39 }
 0x725   :  { %2112 = vpow2.f32 %v1629_v27 }
 0x72b   :  { %v2113_v34 = vpop.eup %2112 }
 0x72c   :  { %v1631_v16 = vsel %vm1617_vm6, %v2113_v34, 0.0  ;;  %v1635_v32 = vsel %vm1617_vm6, 0.0, %v2113_v34 }
 0x72d   :  { %v1632_v24 = vsel %vm1619_vm7, %v1631_v16, 0.0  ;;  %v1636_v53 = vsel %vm1619_vm7, %v1635_v32, 0.0 }
 0x72e   :  { %1633 = vadd.xlane.f32.xlu1 %v1632_v24 }
 0x736   :  { %1637 = vadd.xlane.f32.xlu1 %v1636_v53 }
 0x7a1   :  { %v1634_v62 = vpop.xlane.xlu1 %1633 }
 0x7a9   :  { %v1638_v19 = vpop.xlane.xlu1 %1637 }
 0x7aa   :  { %v1639_v7 = vsel %vm1617_vm6, %v1634_v62, %v1638_v19 }
 0x7ab   :  { %2114 = vrcp.f32 %v1639_v7 }
 0x7b1   :  { %v2115_v14 = vpop.eup %2114 }
 0x7b2   :  { %v1641_v33 = vmul.f32 %v2115_v14, %v2113_v34 }
 0x7b4   :  { %1642 = vst.msk [vmem:[%s2831_s8] sm:$0xff] %vm1619_vm7, %v1641_v33 }
 0x7b5   :  { %1647 = vsyncpa [#allocation4], 1 }

</bundles_post_ra>
